<compile_context>
chip_gen: v5e
topology: v5e:2x2
jax: 0.10.0
libtpu: 0.0.40
codegen_flags: <defaults>
</compile_context>

<pallas_src>
import functools
import math

import jax
import jax.numpy as jnp
from jax import lax
from jax.experimental import pallas as pl
from jax.experimental.pallas import tpu as pltpu

_LN_EPS = 1e-5          # torch.nn.LayerNorm default
_LEAKY_SLOPE = 0.01     # torch.nn.LeakyReLU default


# ------------------------------ kernel body ---------------------------------
def _temporal_embed_kernel(num_layers_l, num_layers_zeta, tb, ctx_len, n_nodes,
                           true_h, *refs):
    """Fused forward for one block of `tb` batch elements.

    Ref order:
      samples (1, TB*L, Cp) | rep (L*N, L) | gm_rows (L*N, Cp)
      l params : [W_x, bias0_l, g0, be0] + (nl-1)*[W, b, g, be] + [W_out, b_out]
      wg_T (N, L*N)
      zeta params: [W_agg, bias0_z, g0, be0] + (nz-1)*[W, b, g, be] + [W_out, b_out]
      gm (N, Cp) | out (1, TB, Cp)
      scratch: act_l (TB*L*N, Hp), act_z (TB*N, Hp), out_acc (TB, Cp)

    bias0_* already contain the (batch-invariant) embedding contribution of
    the first layer (emb @ W_emb + b0), so the embedding slabs never enter
    the kernel.
    """
    n_l = 4 * num_layers_l + 2
    n_z = 4 * num_layers_zeta + 2

    x_ref, rep_ref, gm_rows_ref = refs[0], refs[1], refs[2]
    l_params = refs[3:3 + n_l]
    wg_ref = refs[3 + n_l]
    z_params = refs[4 + n_l:4 + n_l + n_z]
    gm_ref = refs[4 + n_l + n_z]
    out_ref = refs[5 + n_l + n_z]
    act_l_ref = refs[6 + n_l + n_z]
    act_z_ref = refs[7 + n_l + n_z]
    out_acc_ref = refs[8 + n_l + n_z]

    ln_rows = ctx_len * n_nodes
    hp = act_l_ref.shape[1]

    # LayerNorm over the true hidden width: padded lanes are exactly 0 before
    # LN (zero weight columns / zero biases), so sums over all Hp lanes with a
    # 1/true_h divisor give the unpadded mean; variance masks the padded lanes.
    lane = lax.broadcasted_iota(jnp.int32, (1, hp), 1)
    ln_mask = (lane < true_h).astype(jnp.float32)
    inv_h = 1.0 / float(true_h)

    def ln_leaky(x, gamma, beta):
        mu = jnp.sum(x, axis=-1, keepdims=True) * inv_h
        d = (x - mu) * ln_mask
        var = jnp.sum(d * d, axis=-1, keepdims=True) * inv_h
        y = (x - mu) * lax.rsqrt(var + _LN_EPS) * gamma + beta
        return jnp.maximum(y, _LEAKY_SLOPE * y)          # LeakyReLU

    def tail_layers(h, plist, n_layers):
        """Hidden layers 1..n-1 plus the output linear (first layer is fused
        into the per-batch loops below)."""
        idx = 0
        for _ in range(n_layers - 1):
            w_h, b_h, g_h, be_h = plist[idx], plist[idx + 1], plist[idx + 2], plist[idx + 3]
            idx += 4
            h = jnp.dot(h.astype(w_h.dtype), w_h[...],
                        preferred_element_type=jnp.float32) + b_h[...]
            h = ln_leaky(h, g_h[...], be_h[...])
        w_o, b_o = plist[idx], plist[idx + 1]
        return jnp.dot(h.astype(w_o.dtype), w_o[...],
                       preferred_element_type=jnp.float32) + b_o[...]

    # ---- inner NN l: per-batch replicate/mask + first layer, then the rest --
    x = x_ref[0]                                              # (TB*L, Cp)
    rep = rep_ref[...]
    gm_rows = gm_rows_ref[...]
    w_x = l_params[0][...]
    bias0_l = l_params[1][...]
    for b in range(tb):                                       # short, unrolled
        xb = x[b * ctx_len:(b + 1) * ctx_len, :]              # (L, Cp)
        xm = jnp.dot(rep, xb, preferred_element_type=jnp.float32) * gm_rows
        act_l_ref[b * ln_rows:(b + 1) * ln_rows, :] = (
            jnp.dot(xm.astype(w_x.dtype), w_x,
                    preferred_element_type=jnp.float32) + bias0_l)
    h = ln_leaky(act_l_ref[...], l_params[2][...], l_params[3][...])
    enc = tail_layers(h, l_params[4:], num_layers_l)          # (TB*L*N, Op)

    # ---- aggregation over (t, i) + first zeta layer (per batch) -------------
    wg = wg_ref[...]                                          # (N, L*N)
    w_agg = z_params[0][...]
    bias0_z = z_params[1][...]
    for b in range(tb):
        agg = jnp.dot(wg, enc[b * ln_rows:(b + 1) * ln_rows, :],
                      preferred_element_type=jnp.float32)     # (N, Op)
        act_z_ref[b * n_nodes:(b + 1) * n_nodes, :] = (
            jnp.dot(agg.astype(w_agg.dtype), w_agg,
                    preferred_element_type=jnp.float32) + bias0_z)
    hz = ln_leaky(act_z_ref[...], z_params[2][...], z_params[3][...])
    dec = tail_layers(hz, z_params[4:], num_layers_zeta)      # (TB*N, Cp)

    # ---- final group-mask reduction over nodes ------------------------------
    gmv = gm_ref[...]
    for b in range(tb):
        out_acc_ref[b:b + 1, :] = jnp.sum(
            dec[b * n_nodes:(b + 1) * n_nodes, :] * gmv, axis=0, keepdims=True)
    out_ref[0] = out_acc_ref[...]


# ------------------------------ host wrapper --------------------------------
def temporal_embed_nn_forward(samples, graphs, params, *, num_layers_l,
                              num_layers_zeta, batch_block=None,
                              weight_dtype=jnp.float32):
    """samples: batch_shape + (L, C); graphs: (L, N, N) -> batch_shape + (C,)."""
    gm = params["group_mask"].astype(jnp.float32)
    emb = params["embeddings"].astype(jnp.float32)
    w = params["w"].astype(jnp.float32)
    L, N, E = emb.shape
    C = gm.shape[1]
    lp, zp = list(params["l"]), list(params["zeta"])
    H = lp[0].shape[1]            # true hidden width a
    O = lp[-2].shape[1]           # out_dim_l

    def rup(v, m=128):
        return ((v + m - 1) // m) * m

    Cp, Hp, Op = rup(C), rup(H), rup(O)

    def pad2(a, r, c):
        return jnp.pad(a, ((0, r - a.shape[0]), (0, c - a.shape[1])))

    hi = lax.Precision.HIGHEST
    # ----- pad + repack l params; embedding part of layer 0 folded into bias0
    w_x = pad2(lp[0], Cp, Hp)
    bias0_l = jnp.matmul(emb.reshape(L * N, E), pad2(lp[1], E, Hp),
                         precision=hi) + pad2(lp[2], 1, Hp)           # (L*N, Hp)
    l_kparams = [w_x.astype(weight_dtype), bias0_l,
                 pad2(lp[3], 1, Hp), pad2(lp[4], 1, Hp)]
    idx = 5
    for _ in range(num_layers_l - 1):
        l_kparams += [pad2(lp[idx], Hp, Hp).astype(weight_dtype),
                      pad2(lp[idx + 1], 1, Hp), pad2(lp[idx + 2], 1, Hp),
                      pad2(lp[idx + 3], 1, Hp)]
        idx += 4
    l_kparams += [pad2(lp[idx], Hp, Op).astype(weight_dtype), pad2(lp[idx + 1], 1, Op)]

    # ----- pad + repack zeta params (embedding of last timestep -> bias0_z) --
    w_agg = pad2(zp[0], Op, Hp)
    bias0_z = jnp.matmul(emb[-1], pad2(zp[1], E, Hp),
                         precision=hi) + pad2(zp[2], 1, Hp)           # (N, Hp)
    z_kparams = [w_agg.astype(weight_dtype), bias0_z,
                 pad2(zp[3], 1, Hp), pad2(zp[4], 1, Hp)]
    idx = 5
    for _ in range(num_layers_zeta - 1):
        z_kparams += [pad2(zp[idx], Hp, Hp).astype(weight_dtype),
                      pad2(zp[idx + 1], 1, Hp), pad2(zp[idx + 2], 1, Hp),
                      pad2(zp[idx + 3], 1, Hp)]
        idx += 4
    z_kparams += [pad2(zp[idx], Hp, Cp).astype(weight_dtype), pad2(zp[idx + 1], 1, Cp)]

    # ----- batch-invariant structural constants (no TB tiling, no krons) -----
    gm_pad = pad2(gm, N, Cp)                                           # (N, Cp)
    gm_rows = jnp.tile(gm_pad, (L, 1))                                 # (L*N, Cp)
    rep = jnp.repeat(jnp.eye(L, dtype=jnp.float32), N, axis=0)         # (L*N, L)
    wg_t = (w * graphs.astype(jnp.float32)).reshape(L * N, N).T        # (N, L*N)

    # ----- samples: flatten batch, pad channels to lane-dense Cp -------------
    batch_shape = samples.shape[:-2]
    B = math.prod(batch_shape) if batch_shape else 1
    x = samples.reshape(B, L, C).astype(jnp.float32)
    x = jnp.pad(x, ((0, 0), (0, 0), (0, Cp - C)))

    # TB heuristic: fill the MXU M dimension (>=256 rows) but keep >=2 grid
    # steps so the "parallel" batch axis can span both v7x TensorCores.
    if batch_block is None:
        TB = max(1, min(B, -(-256 // (L * N))))
        if B > 1 and TB >= B:
            TB = -(-B // 2)
    else:
        TB = max(1, min(batch_block, B))
    n_blocks = pl.cdiv(B, TB)
    B_pad = n_blocks * TB
    if B_pad != B:
        x = jnp.pad(x, ((0, B_pad - B), (0, 0), (0, 0)))
    x_blocks = x.reshape(n_blocks, TB * L, Cp)

    in_arrays = [x_blocks, rep, gm_rows, *l_kparams, wg_t, *z_kparams, gm_pad]

    # Only the samples block is pipelined/double-buffered; every grid-invariant
    # operand is placed whole in VMEM exactly once (single buffer).
    vmem_whole = lambda: pl.BlockSpec(memory_space=pltpu.MemorySpace.VMEM)
    in_specs = ([pl.BlockSpec((1, TB * L, Cp), lambda i: (i, 0, 0))]
                + [vmem_whole() for _ in in_arrays[1:]])
    out_specs = pl.BlockSpec((1, TB, Cp), lambda i: (i, 0, 0))

    rows_l, rows_z = TB * L * N, TB * N
    flops_per_block = 2 * (
        TB * (L * N) * L * Cp
        + rows_l * Cp * Hp + (num_layers_l - 1) * rows_l * Hp * Hp + rows_l * Hp * Op
        + TB * N * (L * N) * Op
        + rows_z * Op * Hp + (num_layers_zeta - 1) * rows_z * Hp * Hp + rows_z * Hp * Cp)
    cost = pl.CostEstimate(
        flops=int(n_blocks * flops_per_block),
        transcendentals=int(n_blocks * (rows_l * num_layers_l + rows_z * num_layers_zeta)),
        bytes_accessed=int(4 * (sum(int(a.size) for a in in_arrays)
                                + n_blocks * TB * Cp)))

    out = pl.pallas_call(
        functools.partial(_temporal_embed_kernel, num_layers_l, num_layers_zeta,
                          TB, L, N, H),
        out_shape=jax.ShapeDtypeStruct((n_blocks, TB, Cp), jnp.float32),
        grid=(n_blocks,),
        in_specs=in_specs,
        out_specs=out_specs,
        scratch_shapes=[pltpu.VMEM((TB * L * N, Hp), jnp.float32),
                        pltpu.VMEM((TB * N, Hp), jnp.float32),
                        pltpu.VMEM((TB, Cp), jnp.float32)],
        compiler_params=pltpu.CompilerParams(
            dimension_semantics=("parallel",),
            vmem_limit_bytes=48 * 1024 * 1024),
        cost_estimate=cost,
    )(*in_arrays)

    out = out.reshape(B_pad, Cp)[:B, :C]
    return out.reshape(batch_shape + (C,))


# ----------------------------- parameter init -------------------------------
def init_params(key, group_mask, embedding_size, out_dim_l,
                num_layers_l, num_layers_zeta, context_length):
    N, C = group_mask.shape
    E, O, L = embedding_size, out_dim_l, context_length
    hidden = max(4 * C, E, 64)

    def dense(k, fan_in, fan_out):
        return jax.random.normal(k, (fan_in, fan_out), jnp.float32) / math.sqrt(fan_in)

    def mlp_params(kbase, in_split, out_dim, n_layers):
        n_dense = len(in_split) + (n_layers - 1) + 1
        ks = list(jax.random.split(kbase, n_dense))
        p = [dense(ks.pop(0), d, hidden) for d in in_split]   # split first-layer weight
        p += [jnp.zeros((1, hidden), jnp.float32),
              jnp.ones((1, hidden), jnp.float32),
              jnp.zeros((1, hidden), jnp.float32)]
        for _ in range(n_layers - 1):
            p.append(dense(ks.pop(0), hidden, hidden))
            p += [jnp.zeros((1, hidden), jnp.float32),
                  jnp.ones((1, hidden), jnp.float32),
                  jnp.zeros((1, hidden), jnp.float32)]
        p.append(dense(ks.pop(0), hidden, out_dim))
        p.append(jnp.zeros((1, out_dim), jnp.float32))
        return p

    k_emb, k_w, k_l, k_z = jax.random.split(key, 4)
    embeddings = 0.01 * jax.random.normal(k_emb, (L, N, E), jnp.float32)
    # NOTE: the PyTorch module initializes `w` to zeros; we use small random
    # values so the aggregation path is actually exercised numerically.
    w = 0.1 * jax.random.normal(k_w, (L, N, N), jnp.float32)
    return {
        "group_mask": group_mask.astype(jnp.float32),
        "embeddings": embeddings,
        "w": w,
        "l": mlp_params(k_l, (C, E), O, num_layers_l),
        "zeta": mlp_params(k_z, (O, E), C, num_layers_zeta),
    }


# --------------------------- pure-JAX reference -----------------------------
def _ln_leaky_ref(x, gamma, beta):
    mu = jnp.mean(x, axis=-1, keepdims=True)
    var = jnp.mean(jnp.square(x - mu), axis=-1, keepdims=True)
    y = (x - mu) * lax.rsqrt(var + _LN_EPS) * gamma + beta
    return jnp.where(y > 0, y, _LEAKY_SLOPE * y)


def reference_forward(samples, graphs, params, *, num_layers_l, num_layers_zeta):
    gm, emb, w = params["group_mask"], params["embeddings"], params["w"]
    batch_shape = samples.shape[:-2]
    hi = lax.Precision.HIGHEST

    def mlp(x, plist, n_layers):
        w0 = jnp.concatenate([plist[0], plist[1]], axis=0)
        b0, g0, be0 = plist[2], plist[3], plist[4]
        h = _ln_leaky_ref(jnp.matmul(x, w0, precision=hi) + b0, g0, be0)
        idx = 5
        for _ in range(n_layers - 1):
            w_h, b_h, g_h, be_h = plist[idx:idx + 4]
            idx += 4
            h = _ln_leaky_ref(jnp.matmul(h, w_h, precision=hi) + b_h, g_h, be_h)
        w_o, b_o = plist[idx], plist[idx + 1]
        return jnp.matmul(h, w_o, precision=hi) + b_o

    masked = jnp.einsum("...i,ji->...ji", samples, gm)
    ee = jnp.broadcast_to(emb, batch_shape + emb.shape)
    encoded = mlp(jnp.concatenate([masked, ee], axis=-1), params["l"], num_layers_l)
    agg = jnp.einsum("lij,...lio->...jo", w * graphs, encoded, precision=hi)
    dec = mlp(jnp.concatenate([agg, ee[..., -1, :, :]], axis=-1),
              params["zeta"], num_layers_zeta)
    return jnp.einsum("...ij,ij->...j", dec, gm)


if __name__ == "__main__":
    # small, module-consistent shapes
    num_nodes, n_cols = 4, 6
    embedding_size = 8
    out_dim_l = 8
    num_layers_l = 2
    num_layers_zeta = 2
    context_length = 3
    batch = 10            # deliberately not a multiple of batch_block (tail test)
    batch_block = 4       # -> 3 grid steps, exercises padding + multi-block

    key = jax.random.PRNGKey(0)
    k_p, k_s, k_g = jax.random.split(key, 3)

    # group_mask[i, j] = 1 iff column j belongs to node i
    col_to_node = jnp.array([0, 0, 1, 2, 2, 3])
    group_mask = jax.nn.one_hot(col_to_node, num_nodes, dtype=jnp.float32).T  # (4, 6)

    params = init_params(k_p, group_mask, embedding_size, out_dim_l,
                         num_layers_l, num_layers_zeta, context_length)

    samples = jax.random.normal(k_s, (batch, context_length, n_cols), jnp.float32)
    graphs = (jax.random.uniform(k_g, (context_length, num_nodes, num_nodes))
              > 0.5).astype(jnp.float32)

    out = temporal_embed_nn_forward(samples, graphs, params,
                                    num_layers_l=num_layers_l,
                                    num_layers_zeta=num_layers_zeta,
                                    batch_block=batch_block)
    out = jax.block_until_ready(out)

    ref = reference_forward(samples, graphs, params,
                            num_layers_l=num_layers_l,
                            num_layers_zeta=num_layers_zeta)

    assert out.shape == (batch, n_cols), out.shape
    if not jnp.allclose(out, ref, atol=1e-3, rtol=1e-3):
        raise AssertionError(f"kernel/reference mismatch:\n{out}\nvs\n{ref}")
    print("KERNEL_OK")
</pallas_src>

<mosaic_0001>
module attributes {stable_mosaic.version = 11 : i64} {
  func.func @_temporal_embed_kernel(%arg0: i32, %arg1: memref<1x12x128xf32, #tpu.memory_space<vmem>>, %arg2: memref<12x3xf32, #tpu.memory_space<vmem>>, %arg3: memref<12x128xf32, #tpu.memory_space<vmem>>, %arg4: memref<128x128xf32, #tpu.memory_space<vmem>>, %arg5: memref<12x128xf32, #tpu.memory_space<vmem>>, %arg6: memref<1x128xf32, #tpu.memory_space<vmem>>, %arg7: memref<1x128xf32, #tpu.memory_space<vmem>>, %arg8: memref<128x128xf32, #tpu.memory_space<vmem>>, %arg9: memref<1x128xf32, #tpu.memory_space<vmem>>, %arg10: memref<1x128xf32, #tpu.memory_space<vmem>>, %arg11: memref<1x128xf32, #tpu.memory_space<vmem>>, %arg12: memref<128x128xf32, #tpu.memory_space<vmem>>, %arg13: memref<1x128xf32, #tpu.memory_space<vmem>>, %arg14: memref<4x12xf32, #tpu.memory_space<vmem>>, %arg15: memref<128x128xf32, #tpu.memory_space<vmem>>, %arg16: memref<4x128xf32, #tpu.memory_space<vmem>>, %arg17: memref<1x128xf32, #tpu.memory_space<vmem>>, %arg18: memref<1x128xf32, #tpu.memory_space<vmem>>, %arg19: memref<128x128xf32, #tpu.memory_space<vmem>>, %arg20: memref<1x128xf32, #tpu.memory_space<vmem>>, %arg21: memref<1x128xf32, #tpu.memory_space<vmem>>, %arg22: memref<1x128xf32, #tpu.memory_space<vmem>>, %arg23: memref<128x128xf32, #tpu.memory_space<vmem>>, %arg24: memref<1x128xf32, #tpu.memory_space<vmem>>, %arg25: memref<4x128xf32, #tpu.memory_space<vmem>>, %arg26: memref<1x4x128xf32, #tpu.memory_space<vmem>>, %arg27: memref<48x128xf32, #tpu.memory_space<vmem>>, %arg28: memref<16x128xf32, #tpu.memory_space<vmem>>, %arg29: memref<4x128xf32, #tpu.memory_space<vmem>>) attributes {dimension_semantics = [#tpu.dimension_semantics<parallel>], iteration_bounds = array<i64: 3>, scalar_prefetch = 0 : i64, scratch_operands = 3 : i64, tpu.core_type = #tpu.core_type<tc>, window_params = [{transform_indices = @transform_0, window_bounds = array<i64: 1, 12, 128>}, {pipeline_mode = #tpu.pipeline_mode<synchronous>, transform_indices = @transform_1, window_bounds = array<i64: 12, 3>}, {pipeline_mode = #tpu.pipeline_mode<synchronous>, transform_indices = @transform_2, window_bounds = array<i64: 12, 128>}, {pipeline_mode = #tpu.pipeline_mode<synchronous>, transform_indices = @transform_3, window_bounds = array<i64: 128, 128>}, {pipeline_mode = #tpu.pipeline_mode<synchronous>, transform_indices = @transform_4, window_bounds = array<i64: 12, 128>}, {pipeline_mode = #tpu.pipeline_mode<synchronous>, transform_indices = @transform_5, window_bounds = array<i64: 1, 128>}, {pipeline_mode = #tpu.pipeline_mode<synchronous>, transform_indices = @transform_6, window_bounds = array<i64: 1, 128>}, {pipeline_mode = #tpu.pipeline_mode<synchronous>, transform_indices = @transform_7, window_bounds = array<i64: 128, 128>}, {pipeline_mode = #tpu.pipeline_mode<synchronous>, transform_indices = @transform_8, window_bounds = array<i64: 1, 128>}, {pipeline_mode = #tpu.pipeline_mode<synchronous>, transform_indices = @transform_9, window_bounds = array<i64: 1, 128>}, {pipeline_mode = #tpu.pipeline_mode<synchronous>, transform_indices = @transform_10, window_bounds = array<i64: 1, 128>}, {pipeline_mode = #tpu.pipeline_mode<synchronous>, transform_indices = @transform_11, window_bounds = array<i64: 128, 128>}, {pipeline_mode = #tpu.pipeline_mode<synchronous>, transform_indices = @transform_12, window_bounds = array<i64: 1, 128>}, {pipeline_mode = #tpu.pipeline_mode<synchronous>, transform_indices = @transform_13, window_bounds = array<i64: 4, 12>}, {pipeline_mode = #tpu.pipeline_mode<synchronous>, transform_indices = @transform_14, window_bounds = array<i64: 128, 128>}, {pipeline_mode = #tpu.pipeline_mode<synchronous>, transform_indices = @transform_15, window_bounds = array<i64: 4, 128>}, {pipeline_mode = #tpu.pipeline_mode<synchronous>, transform_indices = @transform_16, window_bounds = array<i64: 1, 128>}, {pipeline_mode = #tpu.pipeline_mode<synchronous>, transform_indices = @transform_17, window_bounds = array<i64: 1, 128>}, {pipeline_mode = #tpu.pipeline_mode<synchronous>, transform_indices = @transform_18, window_bounds = array<i64: 128, 128>}, {pipeline_mode = #tpu.pipeline_mode<synchronous>, transform_indices = @transform_19, window_bounds = array<i64: 1, 128>}, {pipeline_mode = #tpu.pipeline_mode<synchronous>, transform_indices = @transform_20, window_bounds = array<i64: 1, 128>}, {pipeline_mode = #tpu.pipeline_mode<synchronous>, transform_indices = @transform_21, window_bounds = array<i64: 1, 128>}, {pipeline_mode = #tpu.pipeline_mode<synchronous>, transform_indices = @transform_22, window_bounds = array<i64: 128, 128>}, {pipeline_mode = #tpu.pipeline_mode<synchronous>, transform_indices = @transform_23, window_bounds = array<i64: 1, 128>}, {pipeline_mode = #tpu.pipeline_mode<synchronous>, transform_indices = @transform_24, window_bounds = array<i64: 4, 128>}, {transform_indices = @transform_25, window_bounds = array<i64: 1, 4, 128>}]} {
    %0 = tpu.iota {dimensions = array<i32: 1>} : vector<1x128xi32>
    %c64_i32 = arith.constant 64 : i32
    %1 = vector.broadcast %c64_i32 : i32 to vector<1x128xi32>
    %2 = arith.cmpi slt, %0, %1 : vector<1x128xi32>
    %3 = arith.extui %2 : vector<1x128xi1> to vector<1x128xi32>
    %4 = arith.sitofp %3 : vector<1x128xi32> to vector<1x128xf32>
    %c0 = arith.constant 0 : index
    %c0_0 = arith.constant 0 : index
    %c0_1 = arith.constant 0 : index
    %5 = vector.load %arg1[%c0, %c0_0, %c0_1] : memref<1x12x128xf32, #tpu.memory_space<vmem>>, vector<1x12x128xf32>
    %6 = vector.shape_cast %5 : vector<1x12x128xf32> to vector<12x128xf32>
    %c0_2 = arith.constant 0 : index
    %c0_3 = arith.constant 0 : index
    %7 = vector.load %arg2[%c0_2, %c0_3] : memref<12x3xf32, #tpu.memory_space<vmem>>, vector<12x3xf32>
    %c0_4 = arith.constant 0 : index
    %c0_5 = arith.constant 0 : index
    %8 = vector.load %arg3[%c0_4, %c0_5] : memref<12x128xf32, #tpu.memory_space<vmem>>, vector<12x128xf32>
    %c0_6 = arith.constant 0 : index
    %c0_7 = arith.constant 0 : index
    %9 = vector.load %arg4[%c0_6, %c0_7] : memref<128x128xf32, #tpu.memory_space<vmem>>, vector<128x128xf32>
    %c0_8 = arith.constant 0 : index
    %c0_9 = arith.constant 0 : index
    %10 = vector.load %arg5[%c0_8, %c0_9] : memref<12x128xf32, #tpu.memory_space<vmem>>, vector<12x128xf32>
    %11 = vector.extract_strided_slice %6 {offsets = [0, 0], sizes = [3, 128], strides = [1, 1]} : vector<12x128xf32> to vector<3x128xf32>
    %cst = arith.constant dense<0.000000e+00> : vector<12x128xf32>
    %12 = tpu.matmul %7, %11, %cst {dimension_numbers = #tpu.dot_dimension_numbers<[1], [0], [0], [1], [0, 0, 1, 1], [], []>} : vector<12x3xf32>, vector<3x128xf32>, vector<12x128xf32> -> vector<12x128xf32>
    %13 = arith.mulf %12, %8 : vector<12x128xf32>
    %cst_10 = arith.constant dense<0.000000e+00> : vector<12x128xf32>
    %14 = tpu.matmul %13, %9, %cst_10 {dimension_numbers = #tpu.dot_dimension_numbers<[1], [0], [0], [1], [0, 0, 1, 1], [], []>} : vector<12x128xf32>, vector<128x128xf32>, vector<12x128xf32> -> vector<12x128xf32>
    %15 = arith.addf %14, %10 : vector<12x128xf32>
    %c0_11 = arith.constant 0 : index
    %c0_12 = arith.constant 0 : index
    %16 = vector.load %arg27[%c0_11, %c0_12] : memref<48x128xf32, #tpu.memory_space<vmem>>, vector<12x128xf32>
    tpu.vector_store %arg27[%c0_11, %c0_12], %15 {strides = array<i32>} : memref<48x128xf32, #tpu.memory_space<vmem>>, vector<12x128xf32>,
    %17 = vector.extract_strided_slice %6 {offsets = [3, 0], sizes = [3, 128], strides = [1, 1]} : vector<12x128xf32> to vector<3x128xf32>
    %cst_13 = arith.constant dense<0.000000e+00> : vector<12x128xf32>
    %18 = tpu.matmul %7, %17, %cst_13 {dimension_numbers = #tpu.dot_dimension_numbers<[1], [0], [0], [1], [0, 0, 1, 1], [], []>} : vector<12x3xf32>, vector<3x128xf32>, vector<12x128xf32> -> vector<12x128xf32>
    %19 = arith.mulf %18, %8 : vector<12x128xf32>
    %cst_14 = arith.constant dense<0.000000e+00> : vector<12x128xf32>
    %20 = tpu.matmul %19, %9, %cst_14 {dimension_numbers = #tpu.dot_dimension_numbers<[1], [0], [0], [1], [0, 0, 1, 1], [], []>} : vector<12x128xf32>, vector<128x128xf32>, vector<12x128xf32> -> vector<12x128xf32>
    %21 = arith.addf %20, %10 : vector<12x128xf32>
    %c12 = arith.constant 12 : index
    %c0_15 = arith.constant 0 : index
    %22 = vector.load %arg27[%c12, %c0_15] : memref<48x128xf32, #tpu.memory_space<vmem>>, vector<12x128xf32>
    tpu.vector_store %arg27[%c12, %c0_15], %21 {strides = array<i32>} : memref<48x128xf32, #tpu.memory_space<vmem>>, vector<12x128xf32>,
    %23 = vector.extract_strided_slice %6 {offsets = [6, 0], sizes = [3, 128], strides = [1, 1]} : vector<12x128xf32> to vector<3x128xf32>
    %cst_16 = arith.constant dense<0.000000e+00> : vector<12x128xf32>
    %24 = tpu.matmul %7, %23, %cst_16 {dimension_numbers = #tpu.dot_dimension_numbers<[1], [0], [0], [1], [0, 0, 1, 1], [], []>} : vector<12x3xf32>, vector<3x128xf32>, vector<12x128xf32> -> vector<12x128xf32>
    %25 = arith.mulf %24, %8 : vector<12x128xf32>
    %cst_17 = arith.constant dense<0.000000e+00> : vector<12x128xf32>
    %26 = tpu.matmul %25, %9, %cst_17 {dimension_numbers = #tpu.dot_dimension_numbers<[1], [0], [0], [1], [0, 0, 1, 1], [], []>} : vector<12x128xf32>, vector<128x128xf32>, vector<12x128xf32> -> vector<12x128xf32>
    %27 = arith.addf %26, %10 : vector<12x128xf32>
    %c24 = arith.constant 24 : index
    %c0_18 = arith.constant 0 : index
    %28 = vector.load %arg27[%c24, %c0_18] : memref<48x128xf32, #tpu.memory_space<vmem>>, vector<12x128xf32>
    tpu.vector_store %arg27[%c24, %c0_18], %27 {strides = array<i32>} : memref<48x128xf32, #tpu.memory_space<vmem>>, vector<12x128xf32>,
    %29 = vector.extract_strided_slice %6 {offsets = [9, 0], sizes = [3, 128], strides = [1, 1]} : vector<12x128xf32> to vector<3x128xf32>
    %cst_19 = arith.constant dense<0.000000e+00> : vector<12x128xf32>
    %30 = tpu.matmul %7, %29, %cst_19 {dimension_numbers = #tpu.dot_dimension_numbers<[1], [0], [0], [1], [0, 0, 1, 1], [], []>} : vector<12x3xf32>, vector<3x128xf32>, vector<12x128xf32> -> vector<12x128xf32>
    %31 = arith.mulf %30, %8 : vector<12x128xf32>
    %cst_20 = arith.constant dense<0.000000e+00> : vector<12x128xf32>
    %32 = tpu.matmul %31, %9, %cst_20 {dimension_numbers = #tpu.dot_dimension_numbers<[1], [0], [0], [1], [0, 0, 1, 1], [], []>} : vector<12x128xf32>, vector<128x128xf32>, vector<12x128xf32> -> vector<12x128xf32>
    %33 = arith.addf %32, %10 : vector<12x128xf32>
    %c36 = arith.constant 36 : index
    %c0_21 = arith.constant 0 : index
    %34 = vector.load %arg27[%c36, %c0_21] : memref<48x128xf32, #tpu.memory_space<vmem>>, vector<12x128xf32>
    tpu.vector_store %arg27[%c36, %c0_21], %33 {strides = array<i32>} : memref<48x128xf32, #tpu.memory_space<vmem>>, vector<12x128xf32>,
    %c0_22 = arith.constant 0 : index
    %c0_23 = arith.constant 0 : index
    %35 = vector.load %arg27[%c0_22, %c0_23] : memref<48x128xf32, #tpu.memory_space<vmem>>, vector<48x128xf32>
    %c0_24 = arith.constant 0 : index
    %c0_25 = arith.constant 0 : index
    %36 = vector.load %arg6[%c0_24, %c0_25] : memref<1x128xf32, #tpu.memory_space<vmem>>, vector<1x128xf32>
    %c0_26 = arith.constant 0 : index
    %c0_27 = arith.constant 0 : index
    %37 = vector.load %arg7[%c0_26, %c0_27] : memref<1x128xf32, #tpu.memory_space<vmem>>, vector<1x128xf32>
    %cst_28 = arith.constant dense<0.000000e+00> : vector<48xf32>
    %38 = vector.multi_reduction <add>, %35, %cst_28 [1] : vector<48x128xf32> to vector<48xf32>
    %39 = vector.shape_cast %38 : vector<48xf32> to vector<48x1xf32>
    %cst_29 = arith.constant 1.562500e-02 : f32
    %40 = vector.broadcast %cst_29 : f32 to vector<48x1xf32>
    %41 = arith.mulf %39, %40 : vector<48x1xf32>
    %42 = vector.broadcast %41 : vector<48x1xf32> to vector<48x128xf32>
    %43 = arith.subf %35, %42 : vector<48x128xf32>
    %44 = vector.broadcast %4 : vector<1x128xf32> to vector<48x128xf32>
    %45 = arith.mulf %43, %44 : vector<48x128xf32>
    %46 = arith.mulf %45, %45 : vector<48x128xf32>
    %cst_30 = arith.constant dense<0.000000e+00> : vector<48xf32>
    %47 = vector.multi_reduction <add>, %46, %cst_30 [1] : vector<48x128xf32> to vector<48xf32>
    %48 = vector.shape_cast %47 : vector<48xf32> to vector<48x1xf32>
    %cst_31 = arith.constant 1.562500e-02 : f32
    %49 = vector.broadcast %cst_31 : f32 to vector<48x1xf32>
    %50 = arith.mulf %48, %49 : vector<48x1xf32>
    %51 = vector.broadcast %41 : vector<48x1xf32> to vector<48x128xf32>
    %52 = arith.subf %35, %51 : vector<48x128xf32>
    %cst_32 = arith.constant 9.99999974E-6 : f32
    %53 = vector.broadcast %cst_32 : f32 to vector<48x1xf32>
    %54 = arith.addf %50, %53 : vector<48x1xf32>
    %55 = math.rsqrt %54 : vector<48x1xf32>
    %56 = vector.broadcast %55 : vector<48x1xf32> to vector<48x128xf32>
    %57 = arith.mulf %52, %56 : vector<48x128xf32>
    %58 = vector.broadcast %36 : vector<1x128xf32> to vector<48x128xf32>
    %59 = arith.mulf %57, %58 : vector<48x128xf32>
    %60 = vector.broadcast %37 : vector<1x128xf32> to vector<48x128xf32>
    %61 = arith.addf %59, %60 : vector<48x128xf32>
    %cst_33 = arith.constant 0.00999999977 : f32
    %62 = vector.broadcast %cst_33 : f32 to vector<48x128xf32>
    %63 = arith.mulf %62, %61 : vector<48x128xf32>
    %64 = arith.maximumf %61, %63 : vector<48x128xf32>
    %c0_34 = arith.constant 0 : index
    %c0_35 = arith.constant 0 : index
    %65 = vector.load %arg8[%c0_34, %c0_35] : memref<128x128xf32, #tpu.memory_space<vmem>>, vector<128x128xf32>
    %cst_36 = arith.constant dense<0.000000e+00> : vector<48x128xf32>
    %66 = tpu.matmul %64, %65, %cst_36 {dimension_numbers = #tpu.dot_dimension_numbers<[1], [0], [0], [1], [0, 0, 1, 1], [], []>} : vector<48x128xf32>, vector<128x128xf32>, vector<48x128xf32> -> vector<48x128xf32>
    %c0_37 = arith.constant 0 : index
    %c0_38 = arith.constant 0 : index
    %67 = vector.load %arg9[%c0_37, %c0_38] : memref<1x128xf32, #tpu.memory_space<vmem>>, vector<1x128xf32>
    %68 = vector.broadcast %67 : vector<1x128xf32> to vector<48x128xf32>
    %69 = arith.addf %66, %68 : vector<48x128xf32>
    %c0_39 = arith.constant 0 : index
    %c0_40 = arith.constant 0 : index
    %70 = vector.load %arg10[%c0_39, %c0_40] : memref<1x128xf32, #tpu.memory_space<vmem>>, vector<1x128xf32>
    %c0_41 = arith.constant 0 : index
    %c0_42 = arith.constant 0 : index
    %71 = vector.load %arg11[%c0_41, %c0_42] : memref<1x128xf32, #tpu.memory_space<vmem>>, vector<1x128xf32>
    %cst_43 = arith.constant dense<0.000000e+00> : vector<48xf32>
    %72 = vector.multi_reduction <add>, %69, %cst_43 [1] : vector<48x128xf32> to vector<48xf32>
    %73 = vector.shape_cast %72 : vector<48xf32> to vector<48x1xf32>
    %cst_44 = arith.constant 1.562500e-02 : f32
    %74 = vector.broadcast %cst_44 : f32 to vector<48x1xf32>
    %75 = arith.mulf %73, %74 : vector<48x1xf32>
    %76 = vector.broadcast %75 : vector<48x1xf32> to vector<48x128xf32>
    %77 = arith.subf %69, %76 : vector<48x128xf32>
    %78 = vector.broadcast %4 : vector<1x128xf32> to vector<48x128xf32>
    %79 = arith.mulf %77, %78 : vector<48x128xf32>
    %80 = arith.mulf %79, %79 : vector<48x128xf32>
    %cst_45 = arith.constant dense<0.000000e+00> : vector<48xf32>
    %81 = vector.multi_reduction <add>, %80, %cst_45 [1] : vector<48x128xf32> to vector<48xf32>
    %82 = vector.shape_cast %81 : vector<48xf32> to vector<48x1xf32>
    %cst_46 = arith.constant 1.562500e-02 : f32
    %83 = vector.broadcast %cst_46 : f32 to vector<48x1xf32>
    %84 = arith.mulf %82, %83 : vector<48x1xf32>
    %85 = vector.broadcast %75 : vector<48x1xf32> to vector<48x128xf32>
    %86 = arith.subf %69, %85 : vector<48x128xf32>
    %cst_47 = arith.constant 9.99999974E-6 : f32
    %87 = vector.broadcast %cst_47 : f32 to vector<48x1xf32>
    %88 = arith.addf %84, %87 : vector<48x1xf32>
    %89 = math.rsqrt %88 : vector<48x1xf32>
    %90 = vector.broadcast %89 : vector<48x1xf32> to vector<48x128xf32>
    %91 = arith.mulf %86, %90 : vector<48x128xf32>
    %92 = vector.broadcast %70 : vector<1x128xf32> to vector<48x128xf32>
    %93 = arith.mulf %91, %92 : vector<48x128xf32>
    %94 = vector.broadcast %71 : vector<1x128xf32> to vector<48x128xf32>
    %95 = arith.addf %93, %94 : vector<48x128xf32>
    %cst_48 = arith.constant 0.00999999977 : f32
    %96 = vector.broadcast %cst_48 : f32 to vector<48x128xf32>
    %97 = arith.mulf %96, %95 : vector<48x128xf32>
    %98 = arith.maximumf %95, %97 : vector<48x128xf32>
    %c0_49 = arith.constant 0 : index
    %c0_50 = arith.constant 0 : index
    %99 = vector.load %arg12[%c0_49, %c0_50] : memref<128x128xf32, #tpu.memory_space<vmem>>, vector<128x128xf32>
    %cst_51 = arith.constant dense<0.000000e+00> : vector<48x128xf32>
    %100 = tpu.matmul %98, %99, %cst_51 {dimension_numbers = #tpu.dot_dimension_numbers<[1], [0], [0], [1], [0, 0, 1, 1], [], []>} : vector<48x128xf32>, vector<128x128xf32>, vector<48x128xf32> -> vector<48x128xf32>
    %c0_52 = arith.constant 0 : index
    %c0_53 = arith.constant 0 : index
    %101 = vector.load %arg13[%c0_52, %c0_53] : memref<1x128xf32, #tpu.memory_space<vmem>>, vector<1x128xf32>
    %102 = vector.broadcast %101 : vector<1x128xf32> to vector<48x128xf32>
    %103 = arith.addf %100, %102 : vector<48x128xf32>
    %c0_54 = arith.constant 0 : index
    %c0_55 = arith.constant 0 : index
    %104 = vector.load %arg14[%c0_54, %c0_55] : memref<4x12xf32, #tpu.memory_space<vmem>>, vector<4x12xf32>
    %c0_56 = arith.constant 0 : index
    %c0_57 = arith.constant 0 : index
    %105 = vector.load %arg15[%c0_56, %c0_57] : memref<128x128xf32, #tpu.memory_space<vmem>>, vector<128x128xf32>
    %c0_58 = arith.constant 0 : index
    %c0_59 = arith.constant 0 : index
    %106 = vector.load %arg16[%c0_58, %c0_59] : memref<4x128xf32, #tpu.memory_space<vmem>>, vector<4x128xf32>
    %107 = vector.extract_strided_slice %103 {offsets = [0, 0], sizes = [12, 128], strides = [1, 1]} : vector<48x128xf32> to vector<12x128xf32>
    %cst_60 = arith.constant dense<0.000000e+00> : vector<4x128xf32>
    %108 = tpu.matmul %104, %107, %cst_60 {dimension_numbers = #tpu.dot_dimension_numbers<[1], [0], [0], [1], [0, 0, 1, 1], [], []>} : vector<4x12xf32>, vector<12x128xf32>, vector<4x128xf32> -> vector<4x128xf32>
    %cst_61 = arith.constant dense<0.000000e+00> : vector<4x128xf32>
    %109 = tpu.matmul %108, %105, %cst_61 {dimension_numbers = #tpu.dot_dimension_numbers<[1], [0], [0], [1], [0, 0, 1, 1], [], []>} : vector<4x128xf32>, vector<128x128xf32>, vector<4x128xf32> -> vector<4x128xf32>
    %110 = arith.addf %109, %106 : vector<4x128xf32>
    %c0_62 = arith.constant 0 : index
    %c0_63 = arith.constant 0 : index
    %111 = vector.load %arg28[%c0_62, %c0_63] : memref<16x128xf32, #tpu.memory_space<vmem>>, vector<4x128xf32>
    tpu.vector_store %arg28[%c0_62, %c0_63], %110 {strides = array<i32>} : memref<16x128xf32, #tpu.memory_space<vmem>>, vector<4x128xf32>,
    %112 = vector.extract_strided_slice %103 {offsets = [12, 0], sizes = [12, 128], strides = [1, 1]} : vector<48x128xf32> to vector<12x128xf32>
    %cst_64 = arith.constant dense<0.000000e+00> : vector<4x128xf32>
    %113 = tpu.matmul %104, %112, %cst_64 {dimension_numbers = #tpu.dot_dimension_numbers<[1], [0], [0], [1], [0, 0, 1, 1], [], []>} : vector<4x12xf32>, vector<12x128xf32>, vector<4x128xf32> -> vector<4x128xf32>
    %cst_65 = arith.constant dense<0.000000e+00> : vector<4x128xf32>
    %114 = tpu.matmul %113, %105, %cst_65 {dimension_numbers = #tpu.dot_dimension_numbers<[1], [0], [0], [1], [0, 0, 1, 1], [], []>} : vector<4x128xf32>, vector<128x128xf32>, vector<4x128xf32> -> vector<4x128xf32>
    %115 = arith.addf %114, %106 : vector<4x128xf32>
    %c4 = arith.constant 4 : index
    %c0_66 = arith.constant 0 : index
    %116 = vector.load %arg28[%c4, %c0_66] : memref<16x128xf32, #tpu.memory_space<vmem>>, vector<4x128xf32>
    tpu.vector_store %arg28[%c4, %c0_66], %115 {strides = array<i32>} : memref<16x128xf32, #tpu.memory_space<vmem>>, vector<4x128xf32>,
    %117 = vector.extract_strided_slice %103 {offsets = [24, 0], sizes = [12, 128], strides = [1, 1]} : vector<48x128xf32> to vector<12x128xf32>
    %cst_67 = arith.constant dense<0.000000e+00> : vector<4x128xf32>
    %118 = tpu.matmul %104, %117, %cst_67 {dimension_numbers = #tpu.dot_dimension_numbers<[1], [0], [0], [1], [0, 0, 1, 1], [], []>} : vector<4x12xf32>, vector<12x128xf32>, vector<4x128xf32> -> vector<4x128xf32>
    %cst_68 = arith.constant dense<0.000000e+00> : vector<4x128xf32>
    %119 = tpu.matmul %118, %105, %cst_68 {dimension_numbers = #tpu.dot_dimension_numbers<[1], [0], [0], [1], [0, 0, 1, 1], [], []>} : vector<4x128xf32>, vector<128x128xf32>, vector<4x128xf32> -> vector<4x128xf32>
    %120 = arith.addf %119, %106 : vector<4x128xf32>
    %c8 = arith.constant 8 : index
    %c0_69 = arith.constant 0 : index
    %121 = vector.load %arg28[%c8, %c0_69] : memref<16x128xf32, #tpu.memory_space<vmem>>, vector<4x128xf32>
    tpu.vector_store %arg28[%c8, %c0_69], %120 {strides = array<i32>} : memref<16x128xf32, #tpu.memory_space<vmem>>, vector<4x128xf32>,
    %122 = vector.extract_strided_slice %103 {offsets = [36, 0], sizes = [12, 128], strides = [1, 1]} : vector<48x128xf32> to vector<12x128xf32>
    %cst_70 = arith.constant dense<0.000000e+00> : vector<4x128xf32>
    %123 = tpu.matmul %104, %122, %cst_70 {dimension_numbers = #tpu.dot_dimension_numbers<[1], [0], [0], [1], [0, 0, 1, 1], [], []>} : vector<4x12xf32>, vector<12x128xf32>, vector<4x128xf32> -> vector<4x128xf32>
    %cst_71 = arith.constant dense<0.000000e+00> : vector<4x128xf32>
    %124 = tpu.matmul %123, %105, %cst_71 {dimension_numbers = #tpu.dot_dimension_numbers<[1], [0], [0], [1], [0, 0, 1, 1], [], []>} : vector<4x128xf32>, vector<128x128xf32>, vector<4x128xf32> -> vector<4x128xf32>
    %125 = arith.addf %124, %106 : vector<4x128xf32>
    %c12_72 = arith.constant 12 : index
    %c0_73 = arith.constant 0 : index
    %126 = vector.load %arg28[%c12_72, %c0_73] : memref<16x128xf32, #tpu.memory_space<vmem>>, vector<4x128xf32>
    tpu.vector_store %arg28[%c12_72, %c0_73], %125 {strides = array<i32>} : memref<16x128xf32, #tpu.memory_space<vmem>>, vector<4x128xf32>,
    %c0_74 = arith.constant 0 : index
    %c0_75 = arith.constant 0 : index
    %127 = vector.load %arg28[%c0_74, %c0_75] : memref<16x128xf32, #tpu.memory_space<vmem>>, vector<16x128xf32>
    %c0_76 = arith.constant 0 : index
    %c0_77 = arith.constant 0 : index
    %128 = vector.load %arg17[%c0_76, %c0_77] : memref<1x128xf32, #tpu.memory_space<vmem>>, vector<1x128xf32>
    %c0_78 = arith.constant 0 : index
    %c0_79 = arith.constant 0 : index
    %129 = vector.load %arg18[%c0_78, %c0_79] : memref<1x128xf32, #tpu.memory_space<vmem>>, vector<1x128xf32>
    %cst_80 = arith.constant dense<0.000000e+00> : vector<16xf32>
    %130 = vector.multi_reduction <add>, %127, %cst_80 [1] : vector<16x128xf32> to vector<16xf32>
    %131 = vector.shape_cast %130 : vector<16xf32> to vector<16x1xf32>
    %cst_81 = arith.constant 1.562500e-02 : f32
    %132 = vector.broadcast %cst_81 : f32 to vector<16x1xf32>
    %133 = arith.mulf %131, %132 : vector<16x1xf32>
    %134 = vector.broadcast %133 : vector<16x1xf32> to vector<16x128xf32>
    %135 = arith.subf %127, %134 : vector<16x128xf32>
    %136 = vector.broadcast %4 : vector<1x128xf32> to vector<16x128xf32>
    %137 = arith.mulf %135, %136 : vector<16x128xf32>
    %138 = arith.mulf %137, %137 : vector<16x128xf32>
    %cst_82 = arith.constant dense<0.000000e+00> : vector<16xf32>
    %139 = vector.multi_reduction <add>, %138, %cst_82 [1] : vector<16x128xf32> to vector<16xf32>
    %140 = vector.shape_cast %139 : vector<16xf32> to vector<16x1xf32>
    %cst_83 = arith.constant 1.562500e-02 : f32
    %141 = vector.broadcast %cst_83 : f32 to vector<16x1xf32>
    %142 = arith.mulf %140, %141 : vector<16x1xf32>
    %143 = vector.broadcast %133 : vector<16x1xf32> to vector<16x128xf32>
    %144 = arith.subf %127, %143 : vector<16x128xf32>
    %cst_84 = arith.constant 9.99999974E-6 : f32
    %145 = vector.broadcast %cst_84 : f32 to vector<16x1xf32>
    %146 = arith.addf %142, %145 : vector<16x1xf32>
    %147 = math.rsqrt %146 : vector<16x1xf32>
    %148 = vector.broadcast %147 : vector<16x1xf32> to vector<16x128xf32>
    %149 = arith.mulf %144, %148 : vector<16x128xf32>
    %150 = vector.broadcast %128 : vector<1x128xf32> to vector<16x128xf32>
    %151 = arith.mulf %149, %150 : vector<16x128xf32>
    %152 = vector.broadcast %129 : vector<1x128xf32> to vector<16x128xf32>
    %153 = arith.addf %151, %152 : vector<16x128xf32>
    %cst_85 = arith.constant 0.00999999977 : f32
    %154 = vector.broadcast %cst_85 : f32 to vector<16x128xf32>
    %155 = arith.mulf %154, %153 : vector<16x128xf32>
    %156 = arith.maximumf %153, %155 : vector<16x128xf32>
    %c0_86 = arith.constant 0 : index
    %c0_87 = arith.constant 0 : index
    %157 = vector.load %arg19[%c0_86, %c0_87] : memref<128x128xf32, #tpu.memory_space<vmem>>, vector<128x128xf32>
    %cst_88 = arith.constant dense<0.000000e+00> : vector<16x128xf32>
    %158 = tpu.matmul %156, %157, %cst_88 {dimension_numbers = #tpu.dot_dimension_numbers<[1], [0], [0], [1], [0, 0, 1, 1], [], []>} : vector<16x128xf32>, vector<128x128xf32>, vector<16x128xf32> -> vector<16x128xf32>
    %c0_89 = arith.constant 0 : index
    %c0_90 = arith.constant 0 : index
    %159 = vector.load %arg20[%c0_89, %c0_90] : memref<1x128xf32, #tpu.memory_space<vmem>>, vector<1x128xf32>
    %160 = vector.broadcast %159 : vector<1x128xf32> to vector<16x128xf32>
    %161 = arith.addf %158, %160 : vector<16x128xf32>
    %c0_91 = arith.constant 0 : index
    %c0_92 = arith.constant 0 : index
    %162 = vector.load %arg21[%c0_91, %c0_92] : memref<1x128xf32, #tpu.memory_space<vmem>>, vector<1x128xf32>
    %c0_93 = arith.constant 0 : index
    %c0_94 = arith.constant 0 : index
    %163 = vector.load %arg22[%c0_93, %c0_94] : memref<1x128xf32, #tpu.memory_space<vmem>>, vector<1x128xf32>
    %cst_95 = arith.constant dense<0.000000e+00> : vector<16xf32>
    %164 = vector.multi_reduction <add>, %161, %cst_95 [1] : vector<16x128xf32> to vector<16xf32>
    %165 = vector.shape_cast %164 : vector<16xf32> to vector<16x1xf32>
    %cst_96 = arith.constant 1.562500e-02 : f32
    %166 = vector.broadcast %cst_96 : f32 to vector<16x1xf32>
    %167 = arith.mulf %165, %166 : vector<16x1xf32>
    %168 = vector.broadcast %167 : vector<16x1xf32> to vector<16x128xf32>
    %169 = arith.subf %161, %168 : vector<16x128xf32>
    %170 = vector.broadcast %4 : vector<1x128xf32> to vector<16x128xf32>
    %171 = arith.mulf %169, %170 : vector<16x128xf32>
    %172 = arith.mulf %171, %171 : vector<16x128xf32>
    %cst_97 = arith.constant dense<0.000000e+00> : vector<16xf32>
    %173 = vector.multi_reduction <add>, %172, %cst_97 [1] : vector<16x128xf32> to vector<16xf32>
    %174 = vector.shape_cast %173 : vector<16xf32> to vector<16x1xf32>
    %cst_98 = arith.constant 1.562500e-02 : f32
    %175 = vector.broadcast %cst_98 : f32 to vector<16x1xf32>
    %176 = arith.mulf %174, %175 : vector<16x1xf32>
    %177 = vector.broadcast %167 : vector<16x1xf32> to vector<16x128xf32>
    %178 = arith.subf %161, %177 : vector<16x128xf32>
    %cst_99 = arith.constant 9.99999974E-6 : f32
    %179 = vector.broadcast %cst_99 : f32 to vector<16x1xf32>
    %180 = arith.addf %176, %179 : vector<16x1xf32>
    %181 = math.rsqrt %180 : vector<16x1xf32>
    %182 = vector.broadcast %181 : vector<16x1xf32> to vector<16x128xf32>
    %183 = arith.mulf %178, %182 : vector<16x128xf32>
    %184 = vector.broadcast %162 : vector<1x128xf32> to vector<16x128xf32>
    %185 = arith.mulf %183, %184 : vector<16x128xf32>
    %186 = vector.broadcast %163 : vector<1x128xf32> to vector<16x128xf32>
    %187 = arith.addf %185, %186 : vector<16x128xf32>
    %cst_100 = arith.constant 0.00999999977 : f32
    %188 = vector.broadcast %cst_100 : f32 to vector<16x128xf32>
    %189 = arith.mulf %188, %187 : vector<16x128xf32>
    %190 = arith.maximumf %187, %189 : vector<16x128xf32>
    %c0_101 = arith.constant 0 : index
    %c0_102 = arith.constant 0 : index
    %191 = vector.load %arg23[%c0_101, %c0_102] : memref<128x128xf32, #tpu.memory_space<vmem>>, vector<128x128xf32>
    %cst_103 = arith.constant dense<0.000000e+00> : vector<16x128xf32>
    %192 = tpu.matmul %190, %191, %cst_103 {dimension_numbers = #tpu.dot_dimension_numbers<[1], [0], [0], [1], [0, 0, 1, 1], [], []>} : vector<16x128xf32>, vector<128x128xf32>, vector<16x128xf32> -> vector<16x128xf32>
    %c0_104 = arith.constant 0 : index
    %c0_105 = arith.constant 0 : index
    %193 = vector.load %arg24[%c0_104, %c0_105] : memref<1x128xf32, #tpu.memory_space<vmem>>, vector<1x128xf32>
    %194 = vector.broadcast %193 : vector<1x128xf32> to vector<16x128xf32>
    %195 = arith.addf %192, %194 : vector<16x128xf32>
    %c0_106 = arith.constant 0 : index
    %c0_107 = arith.constant 0 : index
    %196 = vector.load %arg25[%c0_106, %c0_107] : memref<4x128xf32, #tpu.memory_space<vmem>>, vector<4x128xf32>
    %197 = vector.extract_strided_slice %195 {offsets = [0, 0], sizes = [4, 128], strides = [1, 1]} : vector<16x128xf32> to vector<4x128xf32>
    %198 = arith.mulf %197, %196 : vector<4x128xf32>
    %cst_108 = arith.constant dense<0.000000e+00> : vector<128xf32>
    %199 = vector.multi_reduction <add>, %198, %cst_108 [0] : vector<4x128xf32> to vector<128xf32>
    %200 = vector.shape_cast %199 : vector<128xf32> to vector<1x128xf32>
    %c0_109 = arith.constant 0 : index
    %c0_110 = arith.constant 0 : index
    %201 = vector.load %arg29[%c0_109, %c0_110] : memref<4x128xf32, #tpu.memory_space<vmem>>, vector<1x128xf32>
    tpu.vector_store %arg29[%c0_109, %c0_110], %200 {strides = array<i32>} : memref<4x128xf32, #tpu.memory_space<vmem>>, vector<1x128xf32>,
    %202 = vector.extract_strided_slice %195 {offsets = [4, 0], sizes = [4, 128], strides = [1, 1]} : vector<16x128xf32> to vector<4x128xf32>
    %203 = arith.mulf %202, %196 : vector<4x128xf32>
    %cst_111 = arith.constant dense<0.000000e+00> : vector<128xf32>
    %204 = vector.multi_reduction <add>, %203, %cst_111 [0] : vector<4x128xf32> to vector<128xf32>
    %205 = vector.shape_cast %204 : vector<128xf32> to vector<1x128xf32>
    %c1 = arith.constant 1 : index
    %c0_112 = arith.constant 0 : index
    %206 = vector.load %arg29[%c1, %c0_112] : memref<4x128xf32, #tpu.memory_space<vmem>>, vector<1x128xf32>
    tpu.vector_store %arg29[%c1, %c0_112], %205 {strides = array<i32>} : memref<4x128xf32, #tpu.memory_space<vmem>>, vector<1x128xf32>,
    %207 = vector.extract_strided_slice %195 {offsets = [8, 0], sizes = [4, 128], strides = [1, 1]} : vector<16x128xf32> to vector<4x128xf32>
    %208 = arith.mulf %207, %196 : vector<4x128xf32>
    %cst_113 = arith.constant dense<0.000000e+00> : vector<128xf32>
    %209 = vector.multi_reduction <add>, %208, %cst_113 [0] : vector<4x128xf32> to vector<128xf32>
    %210 = vector.shape_cast %209 : vector<128xf32> to vector<1x128xf32>
    %c2 = arith.constant 2 : index
    %c0_114 = arith.constant 0 : index
    %211 = vector.load %arg29[%c2, %c0_114] : memref<4x128xf32, #tpu.memory_space<vmem>>, vector<1x128xf32>
    tpu.vector_store %arg29[%c2, %c0_114], %210 {strides = array<i32>} : memref<4x128xf32, #tpu.memory_space<vmem>>, vector<1x128xf32>,
    %212 = vector.extract_strided_slice %195 {offsets = [12, 0], sizes = [4, 128], strides = [1, 1]} : vector<16x128xf32> to vector<4x128xf32>
    %213 = arith.mulf %212, %196 : vector<4x128xf32>
    %cst_115 = arith.constant dense<0.000000e+00> : vector<128xf32>
    %214 = vector.multi_reduction <add>, %213, %cst_115 [0] : vector<4x128xf32> to vector<128xf32>
    %215 = vector.shape_cast %214 : vector<128xf32> to vector<1x128xf32>
    %c3 = arith.constant 3 : index
    %c0_116 = arith.constant 0 : index
    %216 = vector.load %arg29[%c3, %c0_116] : memref<4x128xf32, #tpu.memory_space<vmem>>, vector<1x128xf32>
    tpu.vector_store %arg29[%c3, %c0_116], %215 {strides = array<i32>} : memref<4x128xf32, #tpu.memory_space<vmem>>, vector<1x128xf32>,
    %c0_117 = arith.constant 0 : index
    %c0_118 = arith.constant 0 : index
    %217 = vector.load %arg29[%c0_117, %c0_118] : memref<4x128xf32, #tpu.memory_space<vmem>>, vector<4x128xf32>
    %c0_119 = arith.constant 0 : index
    %c0_120 = arith.constant 0 : index
    %c0_121 = arith.constant 0 : index
    %218 = vector.load %arg26[%c0_119, %c0_120, %c0_121] : memref<1x4x128xf32, #tpu.memory_space<vmem>>, vector<1x4x128xf32>
    %219 = vector.shape_cast %218 : vector<1x4x128xf32> to vector<4x128xf32>
    %220 = vector.shape_cast %217 : vector<4x128xf32> to vector<1x4x128xf32>
    tpu.vector_store %arg26[%c0_119, %c0_120, %c0_121], %220 {strides = array<i32>} : memref<1x4x128xf32, #tpu.memory_space<vmem>>, vector<1x4x128xf32>,
    return
  }
  func.func @transform_0(%arg0: i32) -> (i32, i32, i32) {
    %c0_i32 = arith.constant 0 : i32
    %c0_i32_0 = arith.constant 0 : i32
    %c0_i32_1 = arith.constant 0 : i32
    return %arg0, %c0_i32, %c0_i32_0 : i32, i32, i32
  }
  func.func @transform_1(%arg0: i32) -> (i32, i32) {
    %c0_i32 = arith.constant 0 : i32
    %c0_i32_0 = arith.constant 0 : i32
    %c0_i32_1 = arith.constant 0 : i32
    return %c0_i32, %c0_i32_0 : i32, i32
  }
  func.func @transform_2(%arg0: i32) -> (i32, i32) {
    %c0_i32 = arith.constant 0 : i32
    %c0_i32_0 = arith.constant 0 : i32
    %c0_i32_1 = arith.constant 0 : i32
    return %c0_i32, %c0_i32_0 : i32, i32
  }
  func.func @transform_3(%arg0: i32) -> (i32, i32) {
    %c0_i32 = arith.constant 0 : i32
    %c0_i32_0 = arith.constant 0 : i32
    %c0_i32_1 = arith.constant 0 : i32
    return %c0_i32, %c0_i32_0 : i32, i32
  }
  func.func @transform_4(%arg0: i32) -> (i32, i32) {
    %c0_i32 = arith.constant 0 : i32
    %c0_i32_0 = arith.constant 0 : i32
    %c0_i32_1 = arith.constant 0 : i32
    return %c0_i32, %c0_i32_0 : i32, i32
  }
  func.func @transform_5(%arg0: i32) -> (i32, i32) {
    %c0_i32 = arith.constant 0 : i32
    %c0_i32_0 = arith.constant 0 : i32
    %c0_i32_1 = arith.constant 0 : i32
    return %c0_i32, %c0_i32_0 : i32, i32
  }
  func.func @transform_6(%arg0: i32) -> (i32, i32) {
    %c0_i32 = arith.constant 0 : i32
    %c0_i32_0 = arith.constant 0 : i32
    %c0_i32_1 = arith.constant 0 : i32
    return %c0_i32, %c0_i32_0 : i32, i32
  }
  func.func @transform_7(%arg0: i32) -> (i32, i32) {
    %c0_i32 = arith.constant 0 : i32
    %c0_i32_0 = arith.constant 0 : i32
    %c0_i32_1 = arith.constant 0 : i32
    return %c0_i32, %c0_i32_0 : i32, i32
  }
  func.func @transform_8(%arg0: i32) -> (i32, i32) {
    %c0_i32 = arith.constant 0 : i32
    %c0_i32_0 = arith.constant 0 : i32
    %c0_i32_1 = arith.constant 0 : i32
    return %c0_i32, %c0_i32_0 : i32, i32
  }
  func.func @transform_9(%arg0: i32) -> (i32, i32) {
    %c0_i32 = arith.constant 0 : i32
    %c0_i32_0 = arith.constant 0 : i32
    %c0_i32_1 = arith.constant 0 : i32
    return %c0_i32, %c0_i32_0 : i32, i32
  }
  func.func @transform_10(%arg0: i32) -> (i32, i32) {
    %c0_i32 = arith.constant 0 : i32
    %c0_i32_0 = arith.constant 0 : i32
    %c0_i32_1 = arith.constant 0 : i32
    return %c0_i32, %c0_i32_0 : i32, i32
  }
  func.func @transform_11(%arg0: i32) -> (i32, i32) {
    %c0_i32 = arith.constant 0 : i32
    %c0_i32_0 = arith.constant 0 : i32
    %c0_i32_1 = arith.constant 0 : i32
    return %c0_i32, %c0_i32_0 : i32, i32
  }
  func.func @transform_12(%arg0: i32) -> (i32, i32) {
    %c0_i32 = arith.constant 0 : i32
    %c0_i32_0 = arith.constant 0 : i32
    %c0_i32_1 = arith.constant 0 : i32
    return %c0_i32, %c0_i32_0 : i32, i32
  }
  func.func @transform_13(%arg0: i32) -> (i32, i32) {
    %c0_i32 = arith.constant 0 : i32
    %c0_i32_0 = arith.constant 0 : i32
    %c0_i32_1 = arith.constant 0 : i32
    return %c0_i32, %c0_i32_0 : i32, i32
  }
  func.func @transform_14(%arg0: i32) -> (i32, i32) {
    %c0_i32 = arith.constant 0 : i32
    %c0_i32_0 = arith.constant 0 : i32
    %c0_i32_1 = arith.constant 0 : i32
    return %c0_i32, %c0_i32_0 : i32, i32
  }
  func.func @transform_15(%arg0: i32) -> (i32, i32) {
    %c0_i32 = arith.constant 0 : i32
    %c0_i32_0 = arith.constant 0 : i32
    %c0_i32_1 = arith.constant 0 : i32
    return %c0_i32, %c0_i32_0 : i32, i32
  }
  func.func @transform_16(%arg0: i32) -> (i32, i32) {
    %c0_i32 = arith.constant 0 : i32
    %c0_i32_0 = arith.constant 0 : i32
    %c0_i32_1 = arith.constant 0 : i32
    return %c0_i32, %c0_i32_0 : i32, i32
  }
  func.func @transform_17(%arg0: i32) -> (i32, i32) {
    %c0_i32 = arith.constant 0 : i32
    %c0_i32_0 = arith.constant 0 : i32
    %c0_i32_1 = arith.constant 0 : i32
    return %c0_i32, %c0_i32_0 : i32, i32
  }
  func.func @transform_18(%arg0: i32) -> (i32, i32) {
    %c0_i32 = arith.constant 0 : i32
    %c0_i32_0 = arith.constant 0 : i32
    %c0_i32_1 = arith.constant 0 : i32
    return %c0_i32, %c0_i32_0 : i32, i32
  }
  func.func @transform_19(%arg0: i32) -> (i32, i32) {
    %c0_i32 = arith.constant 0 : i32
    %c0_i32_0 = arith.constant 0 : i32
    %c0_i32_1 = arith.constant 0 : i32
    return %c0_i32, %c0_i32_0 : i32, i32
  }
  func.func @transform_20(%arg0: i32) -> (i32, i32) {
    %c0_i32 = arith.constant 0 : i32
    %c0_i32_0 = arith.constant 0 : i32
    %c0_i32_1 = arith.constant 0 : i32
    return %c0_i32, %c0_i32_0 : i32, i32
  }
  func.func @transform_21(%arg0: i32) -> (i32, i32) {
    %c0_i32 = arith.constant 0 : i32
    %c0_i32_0 = arith.constant 0 : i32
    %c0_i32_1 = arith.constant 0 : i32
    return %c0_i32, %c0_i32_0 : i32, i32
  }
  func.func @transform_22(%arg0: i32) -> (i32, i32) {
    %c0_i32 = arith.constant 0 : i32
    %c0_i32_0 = arith.constant 0 : i32
    %c0_i32_1 = arith.constant 0 : i32
    return %c0_i32, %c0_i32_0 : i32, i32
  }
  func.func @transform_23(%arg0: i32) -> (i32, i32) {
    %c0_i32 = arith.constant 0 : i32
    %c0_i32_0 = arith.constant 0 : i32
    %c0_i32_1 = arith.constant 0 : i32
    return %c0_i32, %c0_i32_0 : i32, i32
  }
  func.func @transform_24(%arg0: i32) -> (i32, i32) {
    %c0_i32 = arith.constant 0 : i32
    %c0_i32_0 = arith.constant 0 : i32
    %c0_i32_1 = arith.constant 0 : i32
    return %c0_i32, %c0_i32_0 : i32, i32
  }
  func.func @transform_25(%arg0: i32) -> (i32, i32, i32) {
    %c0_i32 = arith.constant 0 : i32
    %c0_i32_0 = arith.constant 0 : i32
    %c0_i32_1 = arith.constant 0 : i32
    return %arg0, %c0_i32, %c0_i32_0 : i32, i32, i32
  }
}

</mosaic_0001>

<bundles_post_ra>
// kernel: tpu_custom_call.1
= control target key start
LH: loop header
LB: loop body
LE: loop exit
PB: predicated region body
PF: predicated region fallthrough
CT: control target
= control target key end

     0   :  { %s3651_s0 = inlined_call_operand.hbm [shape: f32[3,12,128], index: 0, kind: input, shape index: {}]   ;;  %s3652_s1 = inlined_call_operand.vmem [shape: f32[12,3], index: 1, kind: input, shape index: {}]   ;;  %s3653_s2 = inlined_call_operand.vmem [shape: f32[12,128], index: 2, kind: input, shape index: {}]   ;;  %s3654_s3 = inlined_call_operand.hbm [shape: f32[128,128], index: 3, kind: input, shape index: {}]   ;;  %s3655_s4 = inlined_call_operand.hbm [shape: f32[12,128], index: 4, kind: input, shape index: {}]   ;;  %s3656_s5 = inlined_call_operand.hbm [shape: f32[1,128], index: 5, kind: input, shape index: {}]   ;;  %s3657_s6 = inlined_call_operand.hbm [shape: f32[1,128], index: 6, kind: input, shape index: {}]   ;;  %s3658_s7 = inlined_call_operand.hbm [shape: f32[128,128], index: 7, kind: input, shape index: {}]   ;;  %s3659_s8 = inlined_call_operand.hbm [shape: f32[1,128], index: 8, kind: input, shape index: {}]   ;;  %s3660_s9 = inlined_call_operand.hbm [shape: f32[1,128], index: 9, kind: input, shape index: {}]   ;;  %s3661_s10 = inlined_call_operand.vmem [shape: f32[1,128], index: 10, kind: input, shape index: {}]   ;;  %s3662_s11 = inlined_call_operand.hbm [shape: f32[128,128], index: 11, kind: input, shape index: {}]   ;;  %s3663_s12 = inlined_call_operand.vmem [shape: f32[1,128], index: 12, kind: input, shape index: {}]   ;;  %s3664_s13 = inlined_call_operand.vmem [shape: f32[4,12], index: 13, kind: input, shape index: {}]   ;;  %s3665_s14 = inlined_call_operand.hbm [shape: f32[128,128], index: 14, kind: input, shape index: {}]   ;;  %s3666_s15 = inlined_call_operand.vmem [shape: f32[4,128], index: 15, kind: input, shape index: {}]   ;;  %s3667_s16 = inlined_call_operand.vmem [shape: f32[1,128], index: 16, kind: input, shape index: {}]   ;;  %s3668_s17 = inlined_call_operand.vmem [shape: f32[1,128], index: 17, kind: input, shape index: {}]   ;;  %s3669_s18 = inlined_call_operand.hbm [shape: f32[128,128], index: 18, kind: input, shape index: {}]   ;;  %s3670_s19 = inlined_call_operand.vmem [shape: f32[1,128], index: 19, kind: input, shape index: {}]   ;;  %s3671_s20 = inlined_call_operand.vmem [shape: f32[1,128], index: 20, kind: input, shape index: {}]   ;;  %s3672_s21 = inlined_call_operand.vmem [shape: f32[1,128], index: 21, kind: input, shape index: {}]   ;;  %s3673_s22 = inlined_call_operand.hbm [shape: f32[128,128], index: 22, kind: input, shape index: {}]   ;;  %s3674_s23 = inlined_call_operand.vmem [shape: f32[1,128], index: 23, kind: input, shape index: {}]   ;;  %s3675_s24 = inlined_call_operand.vmem [shape: f32[4,128], index: 24, kind: input, shape index: {}]   ;;  %s3676_s25 = inlined_call_operand.hbm [shape: f32[3,4,128], index: 25, kind: output, shape index: {}]  }
   0x1   :  { %3684 = sst [smem:[#allocation34_spill]] %s3651_s0 }
   0x2   :  { %3685 = sst [smem:[#allocation35_spill]] %s3652_s1 }
   0x3   :  { %3686 = sst [smem:[#allocation36_spill]] %s3653_s2 }
   0x4   :  { %3687 = sst [smem:[#allocation37_spill]] %s3654_s3 }
   0x5   :  { %3688 = sst [smem:[#allocation38_spill]] %s3655_s4 }
   0x6   :  { %3689 = sst [smem:[#allocation39_spill]] %s3656_s5 }
   0x7   :  { %3690 = sst [smem:[#allocation40_spill]] %s3657_s6 }
   0x8   :  { %3691 = sst [smem:[#allocation41_spill]] %s3658_s7 }
   0x9   :  { %3692 = sst [smem:[#allocation42_spill]] %s3659_s8 }
   0xa   :  { %3693 = sst [smem:[#allocation43_spill]] %s3660_s9 }
   0xb   :  { %3694 = sst [smem:[#allocation44_spill]] %s3662_s11 }
   0xc   :  { %3695 = sst [smem:[#allocation45_spill]] %s3665_s14 }
   0xd   :  { %3696 = sst [smem:[#allocation46_spill]] %s3667_s16 }
   0xe   :  { %3697 = sst [smem:[#allocation47_spill]] %s3668_s17 }
   0xf   :  { %3698 = sst [smem:[#allocation48_spill]] %s3670_s19 }
  0x10   :  { %3699 = sst [smem:[#allocation49_spill]] %s3671_s20 }
  0x11   :  { %3700 = sst [smem:[#allocation50_spill]] %s3672_s21 }
  0x12   :  { %3701 = sst [smem:[#allocation51_spill]] %s3674_s23 }
  0x13   :  { %3702 = sst [smem:[#allocation52_spill]] %s3675_s24 }
  0x14   :  { %3703 = sst [smem:[#allocation53_spill]] %s3676_s25 }
  0x15   :  { %30 = vsyncpa [#allocation6], 0 }
  0x16   :  { %32 = vsyncpa [#allocation6 + $0x1], 0 }
  0x17   :  { %33 = vsyncpa [#allocation9], 0 }
  0x18   :  { %34 = vsyncpa [#allocation12], 0 }
  0x19   :  { %35 = vsyncpa [#allocation15], 0 }
  0x1a   :  { %36 = vsyncpa [#allocation18], 0 }
  0x1b   :  { %37 = vsyncpa [#allocation21], 0 }
  0x1c   :  { %38 = vsyncpa [#allocation24], 0 }
  0x1d   :  { %39 = vsyncpa [#allocation7], 0 }
  0x1e   :  { %41 = vsyncpa [#allocation7 + $0x1], 0  ;;  %s3151_s29 = smov 0   ;;  %s3153_s2 = smov 0  }
  0x1f   :  { %s3155_s6 = smov 0   ;;  %s3157_s30 = smov 0  }
  0x20 LB: > { %s3704_s26 = sld [smem:[#allocation37_spill]]  ;;  %s3175_s8 = sadd.s32 4294967295, %s3005_s30   ;;  %s3005_s30 = sphi %s3157_s30, %s3735_s30   ;;  %s3001_s6 = sphi %s3155_s6, %s3734_s6   ;;  %s2997_s2 = sphi %s3153_s2, %s3733_s2   ;;  %s2993_s29 = sphi %s3151_s29, %s3732_s29  }
  0x21   : > { %p2295_p0 = scmp.ge.s32.totalorder %s3005_s30, 1  ;;  %p68_p1 = scmp.eq.s32.totalorder %s3175_s8, 0 }
  0x22   : > { %p608_p2 = scmp.lt.s32.totalorder %s3005_s30, 4  ;;  %s3007_s4 = smov [#allocation8]  }
  0x23   : > { %s627_s28 = sshll.u32 %s3007_s4, 4  ;;  %s3706_s0 = sld [smem:[#allocation39_spill]]  ;;  %s628_s28 = int_to_ptr.vmem [resolvable:$true] %s627_s28 }
  0x24   : > { %p3180_p3 = pnand %p2295_p0, %p608_p2  ;;  %s3708_s23 = sld [smem:[#allocation41_spill]] }
  0x25   : > { %s3008_s24 = smov [#allocation11]   ;;  %s3681_s20 = smov 128  }
  0x26   : > { %s625_s1 = sshll.u32 %s3704_s26, 4  ;;  %p2399_p4 = pneg %p3180_p3  ;;  %s626_s1 = int_to_ptr.hbm [resolvable:$true] %s625_s1 }
  0x27   : > { %s656_s21 = sshll.u32 %s3008_s24, 4  ;;  %s3682_s19 = smov 8   ;;  %s657_s21 = int_to_ptr.vmem [resolvable:$true] %s656_s21 }
  0x28   : > { %p3191_p5 = pnand %p2399_p4, %p68_p1  ;;  %s3011_s25 = smov [#allocation14]  }
  0x29   : > { %s654_s7 = sshll.u32 %s3706_s0, 4  ;;  %s3709_s0 = sld [smem:[#allocation43_spill]]  ;;  %s655_s7 = int_to_ptr.hbm [resolvable:$true] %s654_s7 }
  0x2a   : > { %s677_s4 = sshll.u32 %s3708_s23, 4  ;;  %s679_s23 = sshll.u32 %s3011_s25, 4  ;;  %s678_s4 = int_to_ptr.hbm [resolvable:$true] %s677_s4  ;;  %s680_s23 = int_to_ptr.vmem [resolvable:$true] %s679_s23 }
  0x2b   : > { %2402 = dma.hbm_to_vmem [thread:$0]  (!%p3191_p5), %s626_s1, 2048, %s628_s28, [#allocation9], %s3681_s20, %s3681_s20, %s3682_s19  }
  0x2c   : > { %2408 = dma.hbm_to_vmem [thread:$0]  (!%p3191_p5), %s655_s7, 16, %s657_s21, [#allocation12]  }
  0x2d   : > { %2414 = dma.hbm_to_vmem [thread:$0]  (!%p3191_p5), %s678_s4, 2048, %s680_s23, [#allocation15], %s3681_s20, %s3681_s20, %s3682_s19  }
  0x2e   : > { %s3012_s24 = smov [#allocation17]   ;;  %s3710_s14 = sld [smem:[#allocation45_spill]] }
  0x2f   : > { %s704_s17 = sshll.u32 %s3709_s0, 4  ;;  %s706_s1 = sshll.u32 %s3012_s24, 4  ;;  %s705_s17 = int_to_ptr.hbm [resolvable:$true] %s704_s17  ;;  %s707_s1 = int_to_ptr.vmem [resolvable:$true] %s706_s1 }
  0x30   : > { %2420 = dma.hbm_to_vmem [thread:$0]  (!%p3191_p5), %s705_s17, 16, %s707_s1, [#allocation18]  }
  0x31   : > { %s3711_s5 = sld [smem:[#allocation38_spill]]  ;;  %s3013_s25 = smov [#allocation20]  }
  0x32   : > { %s740_s16 = sshll.u32 %s3013_s25, 4  ;;  %s3014_s4 = smov [#allocation10]   ;;  %s741_s16 = int_to_ptr.vmem [resolvable:$true] %s740_s16 }
  0x33   : > { %s641_s23 = sshll.u32 %s3014_s4, 4  ;;  %s3712_s26 = sld [smem:[#allocation40_spill]]  ;;  %s642_s23 = int_to_ptr.vmem [resolvable:$true] %s641_s23 }
  0x34   : > { %s738_s21 = sshll.u32 %s3710_s14, 4  ;;  %s3713_s9 = sld [smem:[#allocation42_spill]]  ;;  %s739_s21 = int_to_ptr.hbm [resolvable:$true] %s738_s21 }
  0x35   : > { %2426 = dma.hbm_to_vmem [thread:$0]  (!%p3191_p5), %s739_s21, 2048, %s741_s16, [#allocation21], %s3681_s20, %s3681_s20, %s3682_s19  }
  0x36   : > { %s3015_s25 = smov [#allocation13]   ;;  %s3016_s21 = smov [#allocation16]  }
  0x37   : > { %s639_s0 = sshll.u32 %s3711_s5, 4  ;;  %s668_s16 = sshll.u32 %s3015_s25, 4  ;;  %s640_s0 = int_to_ptr.hbm [resolvable:$true] %s639_s0  ;;  %s669_s16 = int_to_ptr.vmem [resolvable:$true] %s668_s16 }
  0x38   : > { %2405 = dma.hbm_to_vmem [thread:$0]  (!%p3191_p5), %s640_s0, 256, %s642_s23, [#allocation9], %s3681_s20, %s3681_s20, %s3682_s19  }
  0x39   : > { %s666_s17 = sshll.u32 %s3712_s26, 4  ;;  %s694_s4 = sshll.u32 %s3016_s21, 4  ;;  %s667_s17 = int_to_ptr.hbm [resolvable:$true] %s666_s17  ;;  %s695_s4 = int_to_ptr.vmem [resolvable:$true] %s694_s4 }
  0x3a   : > { %s692_s5 = sshll.u32 %s3713_s9, 4  ;;  %s3714_s11 = sld [smem:[#allocation44_spill]]  ;;  %s693_s5 = int_to_ptr.hbm [resolvable:$true] %s692_s5 }
  0x3b   : > { %2411 = dma.hbm_to_vmem [thread:$0]  (!%p3191_p5), %s667_s17, 16, %s669_s16, [#allocation12]  }
  0x3c   : > { %2417 = dma.hbm_to_vmem [thread:$0]  (!%p3191_p5), %s693_s5, 16, %s695_s4, [#allocation15]  }
  0x3d   : > { %s761_s1 = sshll.u32 %s3669_s18, 4  ;;  %s3017_s7 = smov [#allocation19]   ;;  %s762_s1 = int_to_ptr.hbm [resolvable:$true] %s761_s1 }
  0x3e   : > { %s720_s17 = sshll.u32 %s3017_s7, 4  ;;  %s3018_s9 = smov [#allocation22]   ;;  %s721_s17 = int_to_ptr.vmem [resolvable:$true] %s720_s17 }
  0x3f   : > { %s763_s5 = sshll.u32 %s3018_s9, 4  ;;  %s784_s21 = sshll.u32 %s3673_s22, 4  ;;  %s764_s5 = int_to_ptr.vmem [resolvable:$true] %s763_s5  ;;  %s785_s21 = int_to_ptr.hbm [resolvable:$true] %s784_s21 }
  0x40   : > { %s718_s26 = sshll.u32 %s3714_s11, 4  ;;  %s3019_s4 = smov [#allocation23]   ;;  %s719_s26 = int_to_ptr.hbm [resolvable:$true] %s718_s26 }
  0x41   : > { %2423 = dma.hbm_to_vmem [thread:$0]  (!%p3191_p5), %s719_s26, 2048, %s721_s17, [#allocation18], %s3681_s20, %s3681_s20, %s3682_s19  }
  0x42   : > { %2429 = dma.hbm_to_vmem [thread:$0]  (!%p3191_p5), %s762_s1, 2048, %s764_s5, [#allocation21], %s3681_s20, %s3681_s20, %s3682_s19  }
  0x43   : > { %s786_s24 = sshll.u32 %s3019_s4, 4  ;;  %s2294_s28 = sadd.s32 4294967294, %s3005_s30   ;;  %s787_s24 = int_to_ptr.vmem [resolvable:$true] %s786_s24 }
  0x44   : > { %2432 = dma.hbm_to_vmem [thread:$0]  (!%p3191_p5), %s785_s21, 2048, %s787_s24, [#allocation24], %s3681_s20, %s3681_s20, %s3682_s19  }
  0x45   : > { %s3267_s26 = sadd.s32 1, %s3005_s30   ;;  %s54_s0 = sadd.s32 1, %s3001_s6 }
  0x46   : > { %s51_s23 = ssub.s32 %s3005_s30, %s3267_s26  ;;  %p61_p6 = scmp.ne.s32.totalorder %s3001_s6, %s2997_s2 }
  0x47   : > { %p52_p7 = scmp.eq.s32.totalorder %s51_s23, 0  ;;  %p62_p8 = scmp.eq.s32.totalorder %s3005_s30, 0 }
  0x48   : > { %p67_p9 = scmp.ne.s32.totalorder %s2997_s2, %s2993_s29  ;;  %p595_p10 = scmp.eq.s32.totalorder %s3175_s8, 2 }
  0x49   : > { %s3279_s1 = scalar_select %p52_p7, %s3001_s6, %s54_s0  }
  0x4a   : > { %p3283_p11 = por %p68_p1, %p67_p9  ;;  %p3287_p12 = por %p595_p10, %p61_p6 }
  0x4b   : > { %p601_p13 = scmp.eq.s32.totalorder %s2294_s28, 2  ;;  %p63_p0 = por %p62_p8, %p61_p6 }
  0x4c   : > { %s806_s17 = sand.u32 1, %s3001_s6   ;;  %p2452_p4 = scmp.lt.s32.totalorder %s3005_s30, 3 }
  0x4d   : > { %p3292_p2 = por %p601_p13, %p67_p9  ;;  %s2308_s5 = sshll.u32 %s806_s17, 4 }
  0x4e   : > { %s2350_s25 = sshll.u32 %s3005_s30, 4  ;;  %s3718_s4 = sld [smem:[#allocation34_spill]] }
  0x4f   : > { %s810_s23 = scalar_lea.vmem [#allocation5], %s2308_s5  ;;  %p3301_p5 = pnand %p2452_p4, %p63_p0 }
  0x50   : > { %s818_s20 = sshll.u32 %s810_s23, 4  ;;  %s807_s19 = scalar_lea.sflag [#allocation6], %s806_s17  ;;  %s819_s20 = int_to_ptr.vmem [resolvable:$true] %s818_s20 }
  0x51   : > { %p2889_p7 = pneg %p3301_p5 }
  0x54   : > { %s815_s24 = scalar_lea.hbm %s3718_s4, %s2350_s25  ;;  %s2892_s5 = scalar_lea.hbm %s3718_s4, 48 }
  0x55   : > { %s816_s0 = sshll.u32 %s815_s24, 4  ;;  %s817_s0 = int_to_ptr.hbm [resolvable:$true] %s816_s0 }
  0x56   : > { %s2885_s11 = sshra.s32 %s817_s0, 4  ;;  %s2886_s11 = int_to_ptr.hbm [resolvable:$true] %s2885_s11 }
  0x57   : > { %s2887_s14 = scalar_lea.hbm %s2886_s11, 16  ;;  %p2893_p10 = scmp.lt.s32.totalorder %s2886_s11, %s3718_s4 }
  0x58   : > { %p2888_p6 = scmp.ne.s32.totalorder %s2886_s11, %s2887_s14  ;;  %p2894_p13 = scmp.lt.s32.totalorder %s2892_s5, %s2887_s14 }
  0x5a   : > { %p2890_p8 = pnand %p2889_p7, %p2888_p6  ;;  %p2895_p0 = por %p2894_p13, %p2893_p10 }
  0x5c   : > { %p2891_p9 = pneg %p2890_p8 }
  0x5e   : > { %p2896_p4 = pnand %p2895_p0, %p2891_p9 }
  0x60   : > { %2899 = shalt.err (!%p2896_p4)
}
  0x61   : > { %s3720_s17 = smov 8   ;;  %s3721_s23 = smov 128  }
  0x62   : > { %2436 = dma.hbm_to_vmem [thread:$0]  (!%p3301_p5), %s817_s0, 256, %s819_s20, %s807_s19, %s3721_s23, %s3721_s23, %s3720_s17  }
  0x63   : > { %830 = sbr.rel (%p3180_p3) target bundleno = 2470 (0x9a6), region = 120  ;;  %s3321_s25 = sand.u32 (!%p3180_p3), 1, %s2997_s2  }
  0x64   : > { %s2312_s11 = sshll.u32 (!%p3180_p3), %s3321_s25, 4  ;;  %s833_s14 = scalar_lea.sflag (!%p3180_p3), [#allocation6], %s3321_s25 }
  0x65   : > { %s836_s16 = scalar_lea.vmem (!%p3180_p3), [#allocation5], %s2312_s11 }
  0x68   : > { %2960 = dma.done.wait (%p3283_p11), %s833_s14, 256  }
  0x69   : > { %2962 = vsyncadd (%p3283_p11), %s833_s14, 4294967040 }
  0x6a   : > { %2964 = dma.done.wait (%p68_p1), [#allocation9], 2304  }
  0x6b   : > { %2966 = vsyncadd (%p68_p1), [#allocation9], 4294964992 }
  0x6c   : > { %2968 = dma.done.wait (%p68_p1), [#allocation12], 32  }
  0x6d   : > { %2970 = vsyncadd (%p68_p1), [#allocation12], 4294967264 }
  0x6e   : > { %2972 = dma.done.wait (%p68_p1), [#allocation15], 2064  }
  0x6f   : > { %2974 = vsyncadd (%p68_p1), [#allocation15], 4294965232 }
  0x70   : > { %2976 = dma.done.wait (%p68_p1), [#allocation18], 2064  }
  0x71   : > { %2978 = vsyncadd (%p68_p1), [#allocation18], 4294965232 }
  0x72   : > { %2980 = dma.done.wait (%p68_p1), [#allocation21], 4096  }
  0x73   : > { %2982 = vsyncadd (%p68_p1), [#allocation21], 4294963200 }
  0x74   : > { %2984 = dma.done.wait (%p68_p1), [#allocation24], 2048  }
  0x75   : > { %2986 = vsyncadd (%p68_p1), [#allocation24], 4294965248  ;;  %vm995_vm0 = vcmask 1042432   ;;  %vm988_vm1 = vcmask 23552   ;;  %v964_v0 = vld [vmem:[%s836_s16] sm:$0xff]  ;;  %s3722_s27 = sld [smem:[#allocation35_spill]]  ;;  %v959_v62 = vlaneseq }
  0x76   : > { %vm1103_vm2 = vcmask 1041408   ;;  %2326 = vmatpush.msk.msra.mxu0 %vm995_vm0, %v964_v0  ;;  %v1104_v2 = vrot.slane %v964_v0, 6  ;;  %v1049_v3 = vrot.slane %v964_v0, 3  ;;  %v965_v4 = vld [vmem:[%s836_s16 + $0x8] sm:$0xf]  ;;  %v3363_v8 = vld [vmem:[#allocation8 + $0x70] sm:$0xff] }
  0x77   : > { %v1105_v5 = vrot.slane %v965_v4, 6  ;;  %v1159_v6 = vrot.slane %v965_v4, 1  ;;  %v3361_v7 = vld [vmem:[#allocation8 + $0x78] sm:$0xff]  ;;  %v3369_v10 = vld [vmem:[#allocation8 + $0x68] sm:$0xff]  ;;  %v3380_v12 = vld [vmem:[#allocation8 + $0x60] sm:$0xff]  ;;  %s3723_s21 = sld [smem:[#allocation36_spill]] }
  0x78   : > { %2329 = vmatpush.msk.msra.mxu2 %vm995_vm0, %v1049_v3  ;;  %1024 = vmatpush.msra.mxu3 %v3361_v7  ;;  %v3384_v13 = vld [vmem:[#allocation8 + $0x58] sm:$0xff]  ;;  %v3387_v14 = vld [vmem:[#allocation8 + $0x50] sm:$0xff]  ;;  %v979_v15 = vld [vmem:[#allocation8 + $0x48] sm:$0xff]  ;;  %v960_v63 = vand.u32 127, %v959_v62  ;;  %v3020_v4 = vmov 0.0   ;;  %s3724_s24 = sld [smem:[#allocation46_spill]] }
  0x79   : > { %v1106_v9 = vsel %vm1103_vm2, %v1104_v2, %v1105_v5  ;;  %1187 = vmatpush.msra.mxu1 %v3361_v7  ;;  %v978_v16 = vld [vmem:[#allocation8 + $0x40] sm:$0xff]  ;;  %v977_v17 = vld [vmem:[#allocation8 + $0x38] sm:$0xff]  ;;  %v976_v18 = vld [vmem:[#allocation8 + $0x30] sm:$0xff]  ;;  %s3725_s11 = sld [smem:[#allocation47_spill]]  ;;  %s2324_s20 = sshll.u32 %s3321_s25, 2 }
  0x7a   : > { %2332 = vmatpush.msk.msrb.mxu0 %vm995_vm0, %v1106_v9  ;;  %1025 = vmatpush.msra.mxu3 %v3363_v8  ;;  %v975_v19 = vld [vmem:[#allocation8 + $0x28] sm:$0xff]  ;;  %v974_v20 = vld [vmem:[#allocation8 + $0x20] sm:$0xff]  ;;  %v973_v21 = vld [vmem:[#allocation8 + $0x18] sm:$0xff]  ;;  %vm961_vm3 = vcmp.lt.s32.totalorder %v960_v63, 64  ;;  %s3726_s19 = sld [smem:[#allocation48_spill]]  ;;  %s2347_s3 = sshll.u32 %s3175_s8, 2 }
  0x7b   : > { %v3356_v1 = vld [vmem:[%s3722_s27] sm:$0xff]  ;;  %v3377_v11 = vld [vmem:[%s3722_s27 + $0x8] sm:$0xf]  ;;  %1134 = vmatpush.msrb.mxu2 %v3361_v7  ;;  %1188 = vmatpush.msra.mxu1 %v3363_v8  ;;  %v972_v22 = vld [vmem:[#allocation8 + $0x10] sm:$0xff]  ;;  %v3425_v5 = vsel %vm961_vm3, 1.0, %v3020_v4  ;;  %s3727_s0 = sld [smem:[#allocation49_spill]] }
  0x7c   : > { %2327 = vmatmul.msk.f32.vlgmr.msra.gmra.mxu0 %vm988_vm1, %v3356_v1  ;;  %2330 = vmatmul.msk.f32.vlgmr.msra.gmra.mxu2 %vm988_vm1, %v3356_v1  ;;  %v971_v23 = vld [vmem:[#allocation8 + $0x8] sm:$0xff]  ;;  %v970_v24 = vld [vmem:[#allocation8] sm:$0xff]  ;;  %s3731_s5 = sld [smem:[#allocation53_spill]]  ;;  %s958_s17 = scalar_lea.vmem [#allocation25], %s2324_s20 }
  0x7d   : > { %2335 = vmatpush.msk.msra.mxu0 %vm995_vm0, %v1159_v6  ;;  %1026 = vmatpush.msra.mxu3 %v3369_v10  ;;  %v968_v25 = vld [vmem:[%s3723_s21] sm:$0xff]  ;;  %v969_v28 = vld [vmem:[%s3723_s21 + $0x8] sm:$0xf]  ;;  %v987_v46 = vld [vmem:[#allocation10 + $0x8] sm:$0xf]  ;;  %s2116_s23 = sshll.u32 %s958_s17, 4  ;;  %s2117_s23 = int_to_ptr.vmem [resolvable:$true] %s2116_s23 }
  0x7e   : > { %1135 = vmatpush.msrb.mxu2 %v3363_v8  ;;  %1189 = vmatpush.msra.mxu1 %v3369_v10  ;;  %v986_v43 = vld [vmem:[#allocation10] sm:$0xff]  ;;  %s2104_s14 = scalar_lea.sflag [#allocation7], %s3321_s25 }
  0x7f   : > { %1027 = vmatpush.msra.mxu3 %v3380_v12 }
  0x80   : > { %1136 = vmatpush.msrb.mxu2 %v3369_v10  ;;  %1190 = vmatpush.msra.mxu1 %v3380_v12 }
  0x81   : > { %1028 = vmatpush.msra.mxu3 %v3384_v13 }
  0x82   : > { %1137 = vmatpush.msrb.mxu2 %v3380_v12  ;;  %1191 = vmatpush.msra.mxu1 %v3384_v13 }
  0x83   : > { %1029 = vmatpush.msra.mxu3 %v3387_v14 }
  0x84   : > { %2328 = vmatmul.msk.f32.gmra.mxu0 %vm988_vm1, %v3377_v11  ;;  %2331 = vmatmul.msk.f32.gmra.mxu2 %vm988_vm1, %v3377_v11 }
  0x85   : > { %1030 = vmatpush.msra.mxu3 %v979_v15  ;;  %1138 = vmatpush.msrb.mxu2 %v3384_v13 }
  0x86   : > { %1192 = vmatpush.msra.mxu1 %v3387_v14 }
  0x87   : > { %1031 = vmatpush.msra.mxu3 %v978_v16  ;;  %1139 = vmatpush.msrb.mxu2 %v3387_v14 }
  0x88   : > { %1193 = vmatpush.msra.mxu1 %v979_v15 }
  0x89   : > { %1032 = vmatpush.msra.mxu3 %v977_v17  ;;  %1140 = vmatpush.msrb.mxu2 %v979_v15 }
  0x8a   : > { %1194 = vmatpush.msra.mxu1 %v978_v16 }
  0x8b   : > { %1033 = vmatpush.msra.mxu3 %v976_v18  ;;  %1141 = vmatpush.msrb.mxu2 %v978_v16 }
  0x8c   : > { %2333 = vmatmul.msk.f32.vlgmr.msrb.gmra.mxu0 %vm988_vm1, %v3356_v1  ;;  %1195 = vmatpush.msra.mxu1 %v977_v17 }
  0x8d   : > { %1034 = vmatpush.msra.mxu3 %v975_v19  ;;  %1142 = vmatpush.msrb.mxu2 %v977_v17 }
  0x8e   : > { %1196 = vmatpush.msra.mxu1 %v976_v18 }
  0x8f   : > { %1035 = vmatpush.msra.mxu3 %v974_v20  ;;  %1143 = vmatpush.msrb.mxu2 %v976_v18 }
  0x90   : > { %1197 = vmatpush.msra.mxu1 %v975_v19 }
  0x91   : > { %1036 = vmatpush.msra.mxu3 %v973_v21  ;;  %1144 = vmatpush.msrb.mxu2 %v975_v19 }
  0x92   : > { %1198 = vmatpush.msra.mxu1 %v974_v20 }
  0x93   : > { %1037 = vmatpush.msra.mxu3 %v972_v22  ;;  %1145 = vmatpush.msrb.mxu2 %v974_v20 }
  0x94   : > { %2334 = vmatmul.msk.f32.gmra.mxu0 %vm988_vm1, %v3377_v11  ;;  %1199 = vmatpush.msra.mxu1 %v973_v21 }
  0x95   : > { %1038 = vmatpush.msra.mxu3 %v971_v23  ;;  %1146 = vmatpush.msrb.mxu2 %v973_v21 }
  0x96   : > { %1200 = vmatpush.msra.mxu1 %v972_v22 }
  0x97   : > { %1039 = vmatpush.msra.mxu3 %v970_v24  ;;  %1147 = vmatpush.msrb.mxu2 %v972_v22 }
  0x98   : > { %1201 = vmatpush.msra.mxu1 %v971_v23 }
  0x99   : > { %1077 = vmatpush.msrb.mxu3 %v3361_v7  ;;  %1148 = vmatpush.msrb.mxu2 %v971_v23 }
  0x9a   : > { %1202 = vmatpush.msra.mxu1 %v970_v24 }
  0x9b   : > { %1078 = vmatpush.msrb.mxu3 %v3363_v8  ;;  %1149 = vmatpush.msrb.mxu2 %v970_v24 }
  0x9c   : > { %2336 = vmatmul.msk.f32.vlgmr.msra.gmra.mxu0 %vm988_vm1, %v3356_v1 }
  0x9d   : > { %1079 = vmatpush.msrb.mxu3 %v3369_v10 }
  0x9f   : > { %1080 = vmatpush.msrb.mxu3 %v3380_v12 }
  0xa1   : > { %1081 = vmatpush.msrb.mxu3 %v3384_v13 }
  0xa3   : > { %1082 = vmatpush.msrb.mxu3 %v3387_v14 }
  0xa4   : > { %2337 = vmatmul.msk.f32.gmra.mxu0 %vm988_vm1, %v3377_v11 }
  0xa5   : > { %1083 = vmatpush.msrb.mxu3 %v979_v15 }
  0xa7   : > { %1084 = vmatpush.msrb.mxu3 %v978_v16 }
  0xa9   : > { %1085 = vmatpush.msrb.mxu3 %v977_v17 }
  0xab   : > { %1086 = vmatpush.msrb.mxu3 %v976_v18 }
  0xad   : > { %1087 = vmatpush.msrb.mxu3 %v975_v19 }
  0xaf   : > { %1088 = vmatpush.msrb.mxu3 %v974_v20 }
  0xb1   : > { %1089 = vmatpush.msrb.mxu3 %v973_v21 }
  0xb3   : > { %1090 = vmatpush.msrb.mxu3 %v972_v22 }
  0xb5   : > { %1091 = vmatpush.msrb.mxu3 %v971_v23 }
  0xb7   : > { %1092 = vmatpush.msrb.mxu3 %v970_v24 }
  0xf9   : > { %v1016_v26 = vpop.f32.mrf.mxu0 }
  0xfa   : > { %v1022_v27 = vmul.f32 %v1016_v26, %v968_v25 }
  0xfc   : > { %1040 = vmatmul.f32.vlgmr.msra.gmra.mxu3 %v1022_v27 }
  0xff   : > { %v1069_v31 = vpop.f32.mrf.mxu2 }
 0x100   : > { %v1075_v32 = vmul.f32 %v1069_v31, %v968_v25  ;;  %v1390_v31 = vld [vmem:[#allocation14 + $0x70] sm:$0xff] }
 0x101   : > { %v1019_v29 = vpop.f32.mrf.mxu0 }
 0x102   : > { %v1023_v30 = vmul.f32 %v1019_v29, %v969_v28 }
 0x104   : > { %1043 = vmatmul.f32.gmra.mxu3 %v1023_v30  ;;  %v1391_v30 = vld [vmem:[#allocation14 + $0x78] sm:$0xff] }
 0x105   : > { %1396 = vmatpush.msra.mxu3 %v1391_v30 }
 0x107   : > { %v1072_v35 = vpop.f32.mrf.mxu2  ;;  %1397 = vmatpush.msra.mxu3 %v1390_v31 }
 0x108   : > { %v1076_v36 = vmul.f32 %v1072_v35, %v969_v28  ;;  %v1386_v35 = vld [vmem:[#allocation14 + $0x50] sm:$0xff] }
 0x109   : > { %v1126_v33 = vpop.f32.mrf.mxu0 }
 0x10a   : > { %v1132_v34 = vmul.f32 %v1126_v33, %v968_v25  ;;  %v1388_v33 = vld [vmem:[#allocation14 + $0x60] sm:$0xff] }
 0x10c   : > { %1093 = vmatmul.f32.vlgmr.msrb.gmra.mxu3 %v1075_v32  ;;  %1150 = vmatmul.f32.vlgmr.msrb.gmra.mxu2 %v1132_v34  ;;  %v1389_v32 = vld [vmem:[#allocation14 + $0x68] sm:$0xff]  ;;  %v1387_v34 = vld [vmem:[#allocation14 + $0x58] sm:$0xff] }
 0x10d   : > { %1398 = vmatpush.msra.mxu3 %v1389_v32 }
 0x10f   : > { %1399 = vmatpush.msra.mxu3 %v1388_v33 }
 0x111   : > { %v1129_v37 = vpop.f32.mrf.mxu0  ;;  %1400 = vmatpush.msra.mxu3 %v1387_v34 }
 0x112   : > { %v1133_v38 = vmul.f32 %v1129_v37, %v969_v28  ;;  %v1384_v37 = vld [vmem:[#allocation14 + $0x40] sm:$0xff] }
 0x113   : > { %1401 = vmatpush.msra.mxu3 %v1386_v35 }
 0x114   : > { %1096 = vmatmul.f32.gmra.mxu3 %v1076_v36  ;;  %1153 = vmatmul.f32.gmra.mxu2 %v1133_v38  ;;  %v1385_v36 = vld [vmem:[#allocation14 + $0x48] sm:$0xff]  ;;  %v1383_v38 = vld [vmem:[#allocation14 + $0x38] sm:$0xff] }
 0x115   : > { %1402 = vmatpush.msra.mxu3 %v1385_v36 }
 0x117   : > { %1403 = vmatpush.msra.mxu3 %v1384_v37 }
 0x119   : > { %v1179_v39 = vpop.f32.mrf.mxu0  ;;  %1404 = vmatpush.msra.mxu3 %v1383_v38 }
 0x11a   : > { %v1185_v40 = vmul.f32 %v1179_v39, %v968_v25  ;;  %v1382_v39 = vld [vmem:[#allocation14 + $0x30] sm:$0xff] }
 0x11b   : > { %1405 = vmatpush.msra.mxu3 %v1382_v39 }
 0x11c   : > { %1203 = vmatmul.f32.vlgmr.msra.gmra.mxu1 %v1185_v40  ;;  %v1381_v40 = vld [vmem:[#allocation14 + $0x28] sm:$0xff] }
 0x11d   : > { %1406 = vmatpush.msra.mxu3 %v1381_v40 }
 0x121   : > { %v1182_v41 = vpop.f32.mrf.mxu0 }
 0x122   : > { %v1186_v42 = vmul.f32 %v1182_v41, %v969_v28  ;;  %v1380_v41 = vld [vmem:[#allocation14 + $0x20] sm:$0xff] }
 0x123   : > { %1407 = vmatpush.msra.mxu3 %v1380_v41 }
 0x124   : > { %1206 = vmatmul.f32.gmra.mxu1 %v1186_v42  ;;  %v1379_v42 = vld [vmem:[#allocation14 + $0x18] sm:$0xff] }
 0x125   : > { %1408 = vmatpush.msra.mxu3 %v1379_v42 }
 0x17f   : > { %v1041_v44 = vpop.f32.mrf.mxu3 }
 0x180   : > { %v1042_v45 = vadd.f32 %v1041_v44, %v986_v43  ;;  %v1377_v44 = vld [vmem:[#allocation14 + $0x8] sm:$0xff] }
 0x182   : > { %1220 = vadd.xlane.f32.xlu0 %v1042_v45 }
 0x187   : > { %v1044_v47 = vpop.f32.mrf.mxu3 }
 0x188   : > { %v1045_v48 = vadd.f32 %v1044_v47, %v987_v46 }
 0x18a   : > { %1048 = vst [vmem:[#allocation2 + $0x8] sm:$0xf] %v1045_v48 }
 0x18f   : > { %v1094_v49 = vpop.f32.mrf.mxu3  ;;  %v1151_v50 = vpop.f32.mrf.mxu2 }
 0x190   : > { %v1095_v51 = vadd.f32 %v1094_v49, %v986_v43  ;;  %v1152_v52 = vadd.f32 %v1151_v50, %v986_v43 }
 0x192   : > { %1100 = vst [vmem:[#allocation2 + $0xc] sm:$0xff] %v1095_v51 }
 0x197   : > { %v1097_v53 = vpop.f32.mrf.mxu3  ;;  %v1154_v54 = vpop.f32.mrf.mxu2 }
 0x198   : > { %v1098_v55 = vadd.f32 %v1097_v53, %v987_v46  ;;  %v1155_v56 = vadd.f32 %v1154_v54, %v987_v46 }
 0x199   : > { %v1213_v57 = vld [vmem:[#allocation2 + $0x8] sm:$0xff]  ;;  %v1204_v58 = vpop.f32.mrf.mxu1 }
 0x19a   : > { %1101 = vst [vmem:[#allocation2 + $0x14] sm:$0xf] %v1098_v55  ;;  %1222 = vadd.xlane.f32.xlu0 %v1213_v57  ;;  %v1205_v59 = vadd.f32 %v1204_v58, %v986_v43  ;;  %v1378_v43 = vld [vmem:[#allocation14 + $0x10] sm:$0xff]  ;;  %v3450_v55 = vld [vmem:[#allocation11] ss:$0 sm:$0xff] }
 0x19b   : > { %1158 = vst [vmem:[#allocation2 + $0x20] sm:$0xf] %v1155_v56  ;;  %1409 = vmatpush.msra.mxu3 %v1378_v43  ;;  %v3453_v58 = vld [vmem:[#allocation13] ss:$0 sm:$0xff] }
 0x19c   : > { %1210 = vst [vmem:[#allocation2 + $0x24] sm:$0xff] %v1205_v59 }
 0x19d   : > { %1410 = vmatpush.msra.mxu3 %v1377_v44 }
 0x1a1   : > { %v1214_v60 = vld [vmem:[#allocation2 + $0x10] sm:$0xff]  ;;  %v1207_v0 = vpop.f32.mrf.mxu1 }
 0x1a2   : > { %1224 = vadd.xlane.f32.xlu2 %v1214_v60  ;;  %v1208_v1 = vadd.f32 %v1207_v0, %v987_v46 }
 0x1a3   : > { %v1216_v61 = vld [vmem:[#allocation2 + $0x20] sm:$0xff] }
 0x1a4   : > { %1228 = vadd.xlane.f32.xlu0 %v1216_v61  ;;  %1211 = vst [vmem:[#allocation2 + $0x2c] sm:$0xf] %v1208_v1 }
 0x1aa   : > { %1226 = vadd.xlane.f32.xlu2 %v1152_v52 }
 0x1ab   : > { %v3441_v21 = vld [vmem:[#allocation2 + $0x28] sm:$0xff] }
 0x1f5   : > { %v1221_v2 = vpop.xlane.xlu0 %1220 }
 0x1f6   : > { %v1232_v3 = vmul.f32 0.015625, %v1221_v2 }
 0x1f8   : > { %v3427_v6 = vsub.f32 %v1042_v45, %v1232_v3  ;;  %v1376_v45 = vld [vmem:[#allocation14] sm:$0xff] }
 0x1f9   : > { %1411 = vmatpush.msra.mxu3 %v1376_v45 }
 0x1fa   : > { %v1244_v7 = vmul.f32 %v3425_v5, %v3427_v6 }
 0x1fc   : > { %v1250_v8 = vmul.f32 %v1244_v7, %v1244_v7 }
 0x1fe   : > { %1256 = vadd.xlane.f32.xlu1 %v1250_v8 }
 0x20d   : > { %v1223_v9 = vpop.xlane.xlu0 %1222 }
 0x20e   : > { %v1233_v10 = vmul.f32 0.015625, %v1223_v9 }
 0x210   : > { %v3431_v11 = vsub.f32 %v1213_v57, %v1233_v10 }
 0x212   : > { %v1245_v12 = vmul.f32 %v3425_v5, %v3431_v11 }
 0x214   : > { %v1251_v13 = vmul.f32 %v1245_v12, %v1245_v12 }
 0x215   : > { %v1225_v14 = vpop.xlane.xlu2 %1224 }
 0x216   : > { %v1234_v15 = vmul.f32 0.015625, %v1225_v14  ;;  %1258 = vadd.xlane.f32.xlu1 %v1251_v13 }
 0x217   : > { %v1229_v16 = vpop.xlane.xlu0 %1228 }
 0x218   : > { %v3435_v17 = vsub.f32 %v1214_v60, %v1234_v15  ;;  %v1236_v18 = vmul.f32 0.015625, %v1229_v16 }
 0x21a   : > { %v3437_v19 = vsub.f32 %v1216_v61, %v1236_v18  ;;  %v1246_v20 = vmul.f32 %v3425_v5, %v3435_v17 }
 0x21c   : > { %v1252_v22 = vmul.f32 %v1246_v20, %v1246_v20  ;;  %v1248_v25 = vmul.f32 %v3425_v5, %v3437_v19 }
 0x21d   : > { %v1227_v23 = vpop.xlane.xlu2 %1226 }
 0x21e   : > { %v1235_v24 = vmul.f32 0.015625, %v1227_v23  ;;  %1260 = vadd.xlane.f32.xlu2 %v1252_v22  ;;  %1230 = vadd.xlane.f32.xlu1 %v3441_v21  ;;  %v1254_v28 = vmul.f32 %v1248_v25, %v1248_v25 }
 0x220   : > { %v3446_v26 = vsub.f32 %v1152_v52, %v1235_v24 }
 0x222   : > { %v1247_v27 = vmul.f32 %v3425_v5, %v3446_v26 }
 0x224   : > { %v1253_v29 = vmul.f32 %v1247_v27, %v1247_v27 }
 0x226   : > { %1262 = vadd.xlane.f32.xlu0 %v1253_v29  ;;  %1264 = vadd.xlane.f32.xlu1 %v1254_v28 }
 0x271   : > { %v1257_v46 = vpop.xlane.xlu1 %1256 }
 0x272   : > { %v1268_v47 = vmul.f32 0.015625, %v1257_v46 }
 0x274   : > { %v1274_v48 = vadd.f32 1e-05, %v1268_v47 }
 0x276   : > { %2523 = vrsqrt.f32 %v1274_v48  ;;  %vm1286_vm5 = vweird.f32 %v1274_v48 }
 0x27c   : > { %v2524_v49 = vpop.eup %2523 }
 0x27d   : > { %v1281_v50 = vmul.f32 %v2524_v49, %v1274_v48  ;;  %vm1287_vm4 = vweird.f32 %v2524_v49 }
 0x27e   : > { %vm1288_vm6 = vmor %vm1286_vm5, %vm1287_vm4 }
 0x27f   : > { %v1282_v51 = vmul.f32 %v2524_v49, %v1281_v50 }
 0x281   : > { %v1283_v52 = vmul.f32 0.5, %v1282_v51 }
 0x283   : > { %v1284_v53 = vsub.f32 1.5, %v1283_v52 }
 0x285   : > { %v1285_v54 = vmul.f32 %v2524_v49, %v1284_v53 }
 0x287   : > { %v1289_v56 = vsel %vm1288_vm6, %v2524_v49, %v1285_v54 }
 0x288   : > { %v1340_v57 = vmul.f32 %v1289_v56, %v3427_v6 }
 0x289   : > { %v1259_v59 = vpop.xlane.xlu1 %1258 }
 0x28a   : > { %v1269_v60 = vmul.f32 0.015625, %v1259_v59  ;;  %v1349_v61 = vmul.f32 %v3450_v55, %v1340_v57 }
 0x28c   : > { %v1275_v62 = vadd.f32 1e-05, %v1269_v60  ;;  %v1358_v63 = vadd.f32 %v3453_v58, %v1349_v61 }
 0x28e   : > { %2525 = vrsqrt.f32 %v1275_v62  ;;  %v1364_v0 = vmul.f32 0.01, %v1358_v63  ;;  %vm1296_vm8 = vweird.f32 %v1275_v62 }
 0x290   : > { %v1370_v1 = vmax.f32 %v1358_v63, %v1364_v0 }
 0x291   : > { %v1261_v2 = vpop.xlane.xlu2 %1260  ;;  %v1231_v3 = vpop.xlane.xlu1 %1230 }
 0x292   : > { %v1270_v4 = vmul.f32 0.015625, %v1261_v2  ;;  %v1237_v7 = vmul.f32 0.015625, %v1231_v3  ;;  %1412 = vmatmul.f32.vlgmr.msra.gmra.mxu3 %v1370_v1 }
 0x294   : > { %v2526_v8 = vpop.eup %2525  ;;  %v1276_v9 = vadd.f32 1e-05, %v1270_v4  ;;  %v3458_v6 = vsub.f32 %v3441_v21, %v1237_v7 }
 0x295   : > { %v1291_v10 = vmul.f32 %v2526_v8, %v1275_v62  ;;  %vm1297_vm7 = vweird.f32 %v2526_v8 }
 0x296   : > { %2527 = vrsqrt.f32 %v1276_v9  ;;  %v1249_v12 = vmul.f32 %v3425_v5, %v3458_v6  ;;  %vm1298_vm9 = vmor %vm1296_vm8, %vm1297_vm7  ;;  %vm1306_vm11 = vweird.f32 %v1276_v9 }
 0x297   : > { %v1292_v13 = vmul.f32 %v2526_v8, %v1291_v10 }
 0x298   : > { %v1255_v14 = vmul.f32 %v1249_v12, %v1249_v12 }
 0x299   : > { %v1293_v15 = vmul.f32 0.5, %v1292_v13  ;;  %v1265_v16 = vpop.xlane.xlu1 %1264  ;;  %v1263_v18 = vpop.xlane.xlu0 %1262 }
 0x29a   : > { %v1272_v20 = vmul.f32 0.015625, %v1265_v16  ;;  %v1271_v22 = vmul.f32 0.015625, %v1263_v18  ;;  %1266 = vadd.xlane.f32.xlu2 %v1255_v14 }
 0x29b   : > { %v1294_v23 = vsub.f32 1.5, %v1293_v15 }
 0x29c   : > { %v2528_v24 = vpop.eup %2527  ;;  %v1278_v25 = vadd.f32 1e-05, %v1272_v20  ;;  %v1277_v27 = vadd.f32 1e-05, %v1271_v22 }
 0x29d   : > { %v1295_v21 = vmul.f32 %v2526_v8, %v1294_v23  ;;  %v1301_v28 = vmul.f32 %v2528_v24, %v1276_v9  ;;  %vm1307_vm10 = vweird.f32 %v2528_v24 }
 0x29e   : > { %2529 = vrsqrt.f32 %v1278_v25  ;;  %vm1308_vm12 = vmor %vm1306_vm11, %vm1307_vm10  ;;  %vm1326_vm15 = vweird.f32 %v1278_v25  ;;  %vm1316_vm1 = vweird.f32 %v1277_v27 }
 0x29f   : > { %v1302_v29 = vmul.f32 %v2528_v24, %v1301_v28  ;;  %2531 = vrsqrt.f32 %v1277_v27  ;;  %v1299_v30 = vsel %vm1298_vm9, %v2526_v8, %v1295_v21 }
 0x2a0   : > { %v1341_v31 = vmul.f32 %v1299_v30, %v3431_v11 }
 0x2a1   : > { %v1303_v32 = vmul.f32 0.5, %v1302_v29 }
 0x2a2   : > { %v1350_v33 = vmul.f32 %v3450_v55, %v1341_v31 }
 0x2a3   : > { %v1304_v34 = vsub.f32 1.5, %v1303_v32 }
 0x2a4   : > { %v2530_v35 = vpop.eup %2529  ;;  %v1359_v36 = vadd.f32 %v3453_v58, %v1350_v33 }
 0x2a5   : > { %v2532_v37 = vpop.eup %2531  ;;  %v1305_v38 = vmul.f32 %v2528_v24, %v1304_v34  ;;  %v1321_v39 = vmul.f32 %v2530_v35, %v1278_v25  ;;  %vm1327_vm13 = vweird.f32 %v2530_v35 }
 0x2a6   : > { %v1311_v40 = vmul.f32 %v2532_v37, %v1277_v27  ;;  %v1365_v41 = vmul.f32 0.01, %v1359_v36  ;;  %vm1317_vm14 = vweird.f32 %v2532_v37  ;;  %vm1328_vm0 = vmor %vm1326_vm15, %vm1327_vm13 }
 0x2a7   : > { %v1322_v42 = vmul.f32 %v2530_v35, %v1321_v39  ;;  %v1309_v43 = vsel %vm1308_vm12, %v2528_v24, %v1305_v38  ;;  %vm1318_vm2 = vmor %vm1316_vm1, %vm1317_vm14 }
 0x2a8   : > { %v1312_v44 = vmul.f32 %v2532_v37, %v1311_v40  ;;  %v1371_v45 = vmax.f32 %v1359_v36, %v1365_v41  ;;  %v1342_v11 = vmul.f32 %v1309_v43, %v3435_v17 }
 0x2a9   : > { %v1323_v46 = vmul.f32 0.5, %v1322_v42 }
 0x2aa   : > { %v1313_v47 = vmul.f32 0.5, %v1312_v44  ;;  %1415 = vmatmul.f32.gmra.mxu3 %v1371_v45  ;;  %v1351_v48 = vmul.f32 %v3450_v55, %v1342_v11 }
 0x2ab   : > { %v1324_v49 = vsub.f32 1.5, %v1323_v46 }
 0x2ac   : > { %v1314_v50 = vsub.f32 1.5, %v1313_v47  ;;  %v1360_v51 = vadd.f32 %v3453_v58, %v1351_v48  ;;  %v1604_v48 = vld [vmem:[#allocation19 + $0x78] sm:$0xff] }
 0x2ad   : > { %v1325_v52 = vmul.f32 %v2530_v35, %v1324_v49  ;;  %1609 = vmatpush.msrb.mxu0 %v1604_v48  ;;  %v1603_v49 = vld [vmem:[#allocation19 + $0x70] sm:$0xff] }
 0x2ae   : > { %v1315_v53 = vmul.f32 %v2532_v37, %v1314_v50  ;;  %v1366_v54 = vmul.f32 0.01, %v1360_v51  ;;  %v1602_v50 = vld [vmem:[#allocation19 + $0x68] sm:$0xff] }
 0x2af   : > { %v1329_v56 = vsel %vm1328_vm0, %v2530_v35, %v1325_v52  ;;  %1610 = vmatpush.msrb.mxu0 %v1603_v49  ;;  %v1600_v52 = vld [vmem:[#allocation19 + $0x58] sm:$0xff] }
 0x2b0   : > { %v1372_v17 = vmax.f32 %v1360_v51, %v1366_v54  ;;  %v1319_v57 = vsel %vm1318_vm2, %v2532_v37, %v1315_v53  ;;  %v1344_v60 = vmul.f32 %v1329_v56, %v3437_v19  ;;  %v2513_v19 = vld [vmem:[#allocation16] ss:$0 sm:$0xff]  ;;  %v1601_v51 = vld [vmem:[#allocation19 + $0x60] sm:$0xff]  ;;  %v1599_v53 = vld [vmem:[#allocation19 + $0x50] sm:$0xff] }
 0x2b1   : > { %v1343_v59 = vmul.f32 %v1319_v57, %v3446_v26  ;;  %1611 = vmatpush.msrb.mxu0 %v1602_v50  ;;  %v1598_v54 = vld [vmem:[#allocation19 + $0x48] sm:$0xff]  ;;  %v1597_v56 = vld [vmem:[#allocation19 + $0x40] sm:$0xff]  ;;  %v1595_v57 = vld [vmem:[#allocation19 + $0x30] sm:$0xff] }
 0x2b2   : > { %1418 = vmatmul.f32.gmra.mxu3 %v1372_v17  ;;  %v1353_v63 = vmul.f32 %v3450_v55, %v1344_v60  ;;  %v1596_v17 = vld [vmem:[#allocation19 + $0x38] sm:$0xff]  ;;  %v1593_v60 = vld [vmem:[#allocation19 + $0x20] sm:$0xff] }
 0x2b3   : > { %v1352_v61 = vmul.f32 %v3450_v55, %v1343_v59  ;;  %1612 = vmatpush.msrb.mxu0 %v1601_v51  ;;  %v1594_v59 = vld [vmem:[#allocation19 + $0x28] sm:$0xff] }
 0x2b4   : > { %v1362_v2 = vadd.f32 %v3453_v58, %v1353_v63  ;;  %v1590_v63 = vld [vmem:[#allocation19 + $0x8] sm:$0xff] }
 0x2b5   : > { %v1361_v62 = vadd.f32 %v3453_v58, %v1352_v61  ;;  %1613 = vmatpush.msrb.mxu0 %v1600_v52  ;;  %v1592_v61 = vld [vmem:[#allocation19 + $0x18] sm:$0xff] }
 0x2b6   : > { %v1368_v3 = vmul.f32 0.01, %v1362_v2 }
 0x2b7   : > { %v1367_v0 = vmul.f32 0.01, %v1361_v62  ;;  %1614 = vmatpush.msrb.mxu0 %v1599_v53 }
 0x2b8   : > { %v1374_v4 = vmax.f32 %v1362_v2, %v1368_v3 }
 0x2b9   : > { %v1373_v1 = vmax.f32 %v1361_v62, %v1367_v0  ;;  %1615 = vmatpush.msrb.mxu0 %v1598_v54  ;;  %v1591_v62 = vld [vmem:[#allocation19 + $0x10] sm:$0xff] }
 0x2bb   : > { %1421 = vmatmul.f32.gmra.mxu3 %v1373_v1  ;;  %1616 = vmatpush.msrb.mxu0 %v1597_v56  ;;  %v1589_v1 = vld [vmem:[#allocation19] sm:$0xff] }
 0x2bd   : > { %1617 = vmatpush.msrb.mxu0 %v1596_v17 }
 0x2bf   : > { %1618 = vmatpush.msrb.mxu0 %v1595_v57 }
 0x2c1   : > { %1619 = vmatpush.msrb.mxu0 %v1594_v59 }
 0x2c3   : > { %1424 = vmatmul.f32.gmra.mxu3 %v1374_v4  ;;  %1620 = vmatpush.msrb.mxu0 %v1593_v60 }
 0x2c5   : > { %1621 = vmatpush.msrb.mxu0 %v1592_v61 }
 0x2c7   : > { %1622 = vmatpush.msrb.mxu0 %v1591_v62 }
 0x2c9   : > { %1623 = vmatpush.msrb.mxu0 %v1590_v63 }
 0x2cb   : > { %1624 = vmatpush.msrb.mxu0 %v1589_v1 }
 0x30d   : > { %v1267_v7 = vpop.xlane.xlu2 %1266 }
 0x30e   : > { %v1273_v8 = vmul.f32 0.015625, %v1267_v7 }
 0x310   : > { %v1279_v26 = vadd.f32 1e-05, %v1273_v8 }
 0x312   : > { %2533 = vrsqrt.f32 %v1279_v26  ;;  %vm1336_vm4 = vweird.f32 %v1279_v26 }
 0x315   : > { %v1413_v9 = vpop.f32.mrf.mxu3 }
 0x316   : > { %v1414_v10 = vadd.f32 %v2513_v19, %v1413_v9 }
 0x318   : > { %v2534_v12 = vpop.eup %2533  ;;  %1433 = vadd.xlane.f32.xlu0 %v1414_v10 }
 0x319   : > { %v1331_v13 = vmul.f32 %v2534_v12, %v1279_v26  ;;  %vm1337_vm3 = vweird.f32 %v2534_v12 }
 0x31a   : > { %vm1338_vm5 = vmor %vm1336_vm4, %vm1337_vm3 }
 0x31b   : > { %v1332_v14 = vmul.f32 %v2534_v12, %v1331_v13 }
 0x31d   : > { %v1333_v15 = vmul.f32 0.5, %v1332_v14 }
 0x31f   : > { %v1334_v16 = vsub.f32 1.5, %v1333_v15 }
 0x321   : > { %v1335_v18 = vmul.f32 %v2534_v12, %v1334_v16  ;;  %v3499_v16 = vld [vmem:[#allocation17] ss:$0 sm:$0xff] }
 0x323   : > { %v1339_v20 = vsel %vm1338_vm5, %v2534_v12, %v1335_v18 }
 0x324   : > { %v1345_v22 = vmul.f32 %v1339_v20, %v3458_v6 }
 0x326   : > { %v1354_v23 = vmul.f32 %v3450_v55, %v1345_v22  ;;  %v3505_v22 = vld [vmem:[%s3661_s10] ss:$0 sm:$0xff] }
 0x328   : > { %v1363_v24 = vadd.f32 %v3453_v58, %v1354_v23 }
 0x32a   : > { %v1369_v25 = vmul.f32 0.01, %v1363_v24 }
 0x32c   : > { %v1375_v27 = vmax.f32 %v1363_v24, %v1369_v25 }
 0x32d   : > { %v1416_v21 = vpop.f32.mrf.mxu3 }
 0x32e   : > { %v1417_v28 = vadd.f32 %v2513_v19, %v1416_v21  ;;  %1427 = vmatmul.f32.gmra.mxu3 %v1375_v27 }
 0x330   : > { %1435 = vadd.xlane.f32.xlu1 %v1417_v28 }
 0x335   : > { %v1419_v29 = vpop.f32.mrf.mxu3 }
 0x336   : > { %v1420_v30 = vadd.f32 %v2513_v19, %v1419_v29 }
 0x338   : > { %1437 = vadd.xlane.f32.xlu1 %v1420_v30 }
 0x33e   : > { %v1422_v55 = vpop.f32.mrf.mxu3 }
 0x33f   : > { %v1423_v58 = vadd.f32 %v2513_v19, %v1422_v55 }
 0x346   : > { %v1425_v39 = vpop.f32.mrf.mxu3 }
 0x347   : > { %v3489_v11 = vadd.f32 %v2513_v19, %v1425_v39 }
 0x38b   : > { %v1434_v31 = vpop.xlane.xlu0 %1433 }
 0x38c   : > { %v1445_v32 = vmul.f32 0.015625, %v1434_v31 }
 0x38e   : > { %v3477_v33 = vsub.f32 %v1414_v10, %v1445_v32 }
 0x390   : > { %v1457_v6 = vmul.f32 %v3425_v5, %v3477_v33 }
 0x392   : > { %v1463_v34 = vmul.f32 %v1457_v6, %v1457_v6 }
 0x394   : > { %1469 = vadd.xlane.f32.xlu2 %v1463_v34 }
 0x39c   : > { %1439 = vadd.xlane.f32.xlu2 %v1423_v58 }
 0x3a3   : > { %v1436_v35 = vpop.xlane.xlu1 %1435 }
 0x3a4   : > { %v1446_v36 = vmul.f32 0.015625, %v1436_v35 }
 0x3a6   : > { %v3481_v37 = vsub.f32 %v1417_v28, %v1446_v36 }
 0x3a8   : > { %v1458_v38 = vmul.f32 %v3425_v5, %v3481_v37 }
 0x3aa   : > { %v1464_v40 = vmul.f32 %v1458_v38, %v1458_v38 }
 0x3ab   : > { %v1438_v41 = vpop.xlane.xlu1 %1437 }
 0x3ac   : > { %v1447_v42 = vmul.f32 0.015625, %v1438_v41  ;;  %1471 = vadd.xlane.f32.xlu0 %v1464_v40 }
 0x3ae   : > { %v3485_v43 = vsub.f32 %v1420_v30, %v1447_v42 }
 0x3b0   : > { %v1459_v44 = vmul.f32 %v3425_v5, %v3485_v43 }
 0x3b1   : > { %v1428_v45 = vpop.f32.mrf.mxu3 }
 0x3b2   : > { %v3491_v46 = vadd.f32 %v2513_v19, %v1428_v45  ;;  %v1465_v47 = vmul.f32 %v1459_v44, %v1459_v44 }
 0x3b4   : > { %1443 = vadd.xlane.f32.xlu1 %v3491_v46  ;;  %1441 = vadd.xlane.f32.xlu0 %v3489_v11 }
 0x3b5   : > { %1473 = vadd.xlane.f32.xlu2 %v1465_v47 }
 0x407   : > { %v1470_v0 = vpop.xlane.xlu2 %1469 }
 0x408   : > { %v1481_v2 = vmul.f32 0.015625, %v1470_v0 }
 0x40a   : > { %v1487_v3 = vadd.f32 1e-05, %v1481_v2 }
 0x40c   : > { %2535 = vrsqrt.f32 %v1487_v3  ;;  %vm1499_vm7 = vweird.f32 %v1487_v3 }
 0x40f   : > { %v1440_v4 = vpop.xlane.xlu2 %1439 }
 0x410   : > { %v1448_v7 = vmul.f32 0.015625, %v1440_v4 }
 0x412   : > { %v2536_v8 = vpop.eup %2535  ;;  %v3495_v26 = vsub.f32 %v1423_v58, %v1448_v7 }
 0x413   : > { %v1494_v19 = vmul.f32 %v2536_v8, %v1487_v3  ;;  %vm1500_vm6 = vweird.f32 %v2536_v8 }
 0x414   : > { %v1460_v9 = vmul.f32 %v3425_v5, %v3495_v26  ;;  %vm1501_vm8 = vmor %vm1499_vm7, %vm1500_vm6 }
 0x415   : > { %v1495_v10 = vmul.f32 %v2536_v8, %v1494_v19 }
 0x416   : > { %v1466_v12 = vmul.f32 %v1460_v9, %v1460_v9 }
 0x417   : > { %v1496_v13 = vmul.f32 0.5, %v1495_v10 }
 0x418   : > { %1475 = vadd.xlane.f32.xlu0 %v1466_v12 }
 0x419   : > { %v1497_v14 = vsub.f32 1.5, %v1496_v13 }
 0x41b   : > { %v1498_v15 = vmul.f32 %v2536_v8, %v1497_v14 }
 0x41d   : > { %v1502_v18 = vsel %vm1501_vm8, %v2536_v8, %v1498_v15  ;;  %vm1666_vm8 = vcmask 1043456  }
 0x41e   : > { %v1553_v20 = vmul.f32 %v1502_v18, %v3477_v33 }
 0x41f   : > { %v1472_v23 = vpop.xlane.xlu0 %1471 }
 0x420   : > { %v1482_v24 = vmul.f32 0.015625, %v1472_v23  ;;  %v1562_v25 = vmul.f32 %v3499_v16, %v1553_v20 }
 0x422   : > { %v1488_v27 = vadd.f32 1e-05, %v1482_v24  ;;  %v1571_v21 = vadd.f32 %v3505_v22, %v1562_v25 }
 0x424   : > { %2537 = vrsqrt.f32 %v1488_v27  ;;  %v1577_v28 = vmul.f32 0.01, %v1571_v21  ;;  %vm1509_vm10 = vweird.f32 %v1488_v27 }
 0x426   : > { %v1583_v29 = vmax.f32 %v1571_v21, %v1577_v28 }
 0x427   : > { %v1444_v30 = vpop.xlane.xlu1 %1443  ;;  %v1442_v31 = vpop.xlane.xlu0 %1441 }
 0x428   : > { %v1450_v32 = vmul.f32 0.015625, %v1444_v30  ;;  %v1474_v6 = vpop.xlane.xlu2 %1473  ;;  %v1449_v33 = vmul.f32 0.015625, %v1442_v31  ;;  %1625 = vmatmul.f32.vlgmr.msrb.gmra.mxu0 %v1583_v29  ;;  %v3528_v29 = vld [vmem:[#allocation20 + $0x78] sm:$0xff] }
 0x429   : > { %v1483_v34 = vmul.f32 0.015625, %v1474_v6  ;;  %1782 = vmatpush.msrb.mxu3 %v3528_v29  ;;  %1830 = vmatpush.msra.mxu0 %v3528_v29 }
 0x42a   : > { %v2538_v55 = vpop.eup %2537  ;;  %v3510_v58 = vsub.f32 %v3491_v46, %v1450_v32  ;;  %v3513_v35 = vsub.f32 %v3489_v11, %v1449_v33  ;;  %v3532_v32 = vld [vmem:[#allocation20 + $0x70] sm:$0xff] }
 0x42b   : > { %v1504_v36 = vmul.f32 %v2538_v55, %v1488_v27  ;;  %v1489_v38 = vadd.f32 1e-05, %v1483_v34  ;;  %vm1510_vm9 = vweird.f32 %v2538_v55  ;;  %1783 = vmatpush.msrb.mxu3 %v3532_v32  ;;  %1831 = vmatpush.msra.mxu0 %v3532_v32  ;;  %v3536_v34 = vld [vmem:[#allocation20 + $0x68] sm:$0xff] }
 0x42c   : > { %v1462_v39 = vmul.f32 %v3425_v5, %v3510_v58  ;;  %v1461_v40 = vmul.f32 %v3425_v5, %v3513_v35  ;;  %vm1511_vm11 = vmor %vm1509_vm10, %vm1510_vm9  ;;  %vm1662_vm9 = vcmask 97280  }
 0x42d   : > { %v1505_v41 = vmul.f32 %v2538_v55, %v1504_v36  ;;  %2539 = vrsqrt.f32 %v1489_v38  ;;  %vm1519_vm13 = vweird.f32 %v1489_v38  ;;  %1784 = vmatpush.msrb.mxu3 %v3536_v34  ;;  %1832 = vmatpush.msra.mxu0 %v3536_v34 }
 0x42e   : > { %v1468_v42 = vmul.f32 %v1462_v39, %v1462_v39  ;;  %v1467_v44 = vmul.f32 %v1461_v40, %v1461_v40 }
 0x42f   : > { %v1506_v45 = vmul.f32 0.5, %v1505_v41 }
 0x430   : > { %1479 = vadd.xlane.f32.xlu2 %v1468_v42  ;;  %1477 = vadd.xlane.f32.xlu1 %v1467_v44  ;;  %v1656_v42 = vld [vmem:[#allocation20 + $0x58] sm:$0xff] }
 0x431   : > { %v1507_v46 = vsub.f32 1.5, %v1506_v45 }
 0x433   : > { %v2540_v47 = vpop.eup %2539  ;;  %v1508_v11 = vmul.f32 %v2538_v55, %v1507_v46  ;;  %v1655_v46 = vld [vmem:[#allocation20 + $0x50] sm:$0xff] }
 0x434   : > { %v1514_v48 = vmul.f32 %v2540_v47, %v1489_v38  ;;  %vm1520_vm12 = vweird.f32 %v2540_v47  ;;  %v1657_v38 = vld [vmem:[#allocation20 + $0x60] sm:$0xff] }
 0x435   : > { %v1512_v49 = vsel %vm1511_vm11, %v2538_v55, %v1508_v11  ;;  %vm1521_vm14 = vmor %vm1519_vm13, %vm1520_vm12  ;;  %1785 = vmatpush.msrb.mxu3 %v1657_v38  ;;  %1833 = vmatpush.msra.mxu0 %v1657_v38 }
 0x436   : > { %v1515_v50 = vmul.f32 %v2540_v47, %v1514_v48  ;;  %v1554_v51 = vmul.f32 %v1512_v49, %v3481_v37 }
 0x437   : > { %1786 = vmatpush.msrb.mxu3 %v1656_v42  ;;  %1834 = vmatpush.msra.mxu0 %v1656_v42 }
 0x438   : > { %v1516_v52 = vmul.f32 0.5, %v1515_v50  ;;  %v1563_v53 = vmul.f32 %v3499_v16, %v1554_v51  ;;  %v3545_v50 = vld [vmem:[%s3663_s12] ss:$0 sm:$0xff] }
 0x439   : > { %1787 = vmatpush.msrb.mxu3 %v1655_v46  ;;  %1835 = vmatpush.msra.mxu0 %v1655_v46 }
 0x43a   : > { %v1517_v54 = vsub.f32 1.5, %v1516_v52  ;;  %v1572_v56 = vadd.f32 %v3505_v22, %v1563_v53 }
 0x43c   : > { %v1518_v17 = vmul.f32 %v2540_v47, %v1517_v54  ;;  %v1578_v57 = vmul.f32 0.01, %v1572_v56 }
 0x43e   : > { %v1584_v59 = vmax.f32 %v1572_v56, %v1578_v57  ;;  %v1522_v60 = vsel %vm1521_vm14, %v2540_v47, %v1518_v17 }
 0x43f   : > { %v1555_v61 = vmul.f32 %v1522_v60, %v3485_v43 }
 0x440   : > { %1628 = vmatmul.f32.gmra.mxu0 %v1584_v59 }
 0x441   : > { %v1564_v62 = vmul.f32 %v3499_v16, %v1555_v61 }
 0x443   : > { %v1573_v37 = vadd.f32 %v3505_v22, %v1564_v62 }
 0x445   : > { %v1579_v63 = vmul.f32 0.01, %v1573_v37 }
 0x447   : > { %v1585_v0 = vmax.f32 %v1573_v37, %v1579_v63 }
 0x449   : > { %1631 = vmatmul.f32.gmra.mxu0 %v1585_v0 }
 0x48b   : > { %v1476_v1 = vpop.xlane.xlu0 %1475 }
 0x48c   : > { %v1484_v2 = vmul.f32 0.015625, %v1476_v1  ;;  %v1653_v1 = vld [vmem:[#allocation20 + $0x40] sm:$0xff] }
 0x48e   : > { %v1490_v3 = vadd.f32 1e-05, %v1484_v2  ;;  %v1652_v2 = vld [vmem:[#allocation20 + $0x38] sm:$0xff] }
 0x490   : > { %2541 = vrsqrt.f32 %v1490_v3  ;;  %vm1529_vm0 = vweird.f32 %v1490_v3 }
 0x496   : > { %v2542_v4 = vpop.eup %2541 }
 0x497   : > { %v1524_v7 = vmul.f32 %v2542_v4, %v1490_v3  ;;  %vm1530_vm15 = vweird.f32 %v2542_v4  ;;  %v1651_v3 = vld [vmem:[#allocation20 + $0x30] sm:$0xff] }
 0x498   : > { %vm1531_vm1 = vmor %vm1529_vm0, %vm1530_vm15 }
 0x499   : > { %v1525_v8 = vmul.f32 %v2542_v4, %v1524_v7  ;;  %v1649_v7 = vld [vmem:[#allocation20 + $0x20] sm:$0xff] }
 0x49b   : > { %v1526_v19 = vmul.f32 0.5, %v1525_v8  ;;  %v1648_v8 = vld [vmem:[#allocation20 + $0x18] sm:$0xff] }
 0x49d   : > { %v1527_v9 = vsub.f32 1.5, %v1526_v19  ;;  %v1647_v19 = vld [vmem:[#allocation20 + $0x10] sm:$0xff] }
 0x49f   : > { %v1528_v10 = vmul.f32 %v2542_v4, %v1527_v9  ;;  %v1646_v9 = vld [vmem:[#allocation20 + $0x8] sm:$0xff] }
 0x4a1   : > { %v1532_v43 = vsel %vm1531_vm1, %v2542_v4, %v1528_v10  ;;  %v1650_v4 = vld [vmem:[#allocation20 + $0x28] sm:$0xff]  ;;  %v1645_v10 = vld [vmem:[#allocation20] sm:$0xff] }
 0x4a2   : > { %v1556_v12 = vmul.f32 %v1532_v43, %v3495_v26 }
 0x4a3   : > { %v1480_v13 = vpop.xlane.xlu2 %1479  ;;  %v1478_v14 = vpop.xlane.xlu1 %1477 }
 0x4a4   : > { %v1486_v15 = vmul.f32 0.015625, %v1480_v13  ;;  %v1485_v18 = vmul.f32 0.015625, %v1478_v14  ;;  %v1565_v20 = vmul.f32 %v3499_v16, %v1556_v12 }
 0x4a5   : > { %v1626_v40 = vpop.f32.mrf.mxu0 }
 0x4a6   : > { %v1492_v23 = vadd.f32 1e-05, %v1486_v15  ;;  %v1491_v24 = vadd.f32 1e-05, %v1485_v18  ;;  %v1574_v25 = vadd.f32 %v3505_v22, %v1565_v20  ;;  %v1627_v17 = vadd.f32 %v3545_v50, %v1626_v40 }
 0x4a8   : > { %2543 = vrsqrt.f32 %v1492_v23  ;;  %v1580_v27 = vmul.f32 0.01, %v1574_v25  ;;  %vm1549_vm4 = vweird.f32 %v1492_v23  ;;  %vm1539_vm6 = vweird.f32 %v1491_v24 }
 0x4a9   : > { %2545 = vrsqrt.f32 %v1491_v24 }
 0x4aa   : > { %v1586_v21 = vmax.f32 %v1574_v25, %v1580_v27 }
 0x4ac   : > { %1634 = vmatmul.f32.gmra.mxu0 %v1586_v21  ;;  %v1661_v21 = vld [vmem:[%s3666_s15] sm:$0xf] }
 0x4ae   : > { %v2544_v28 = vpop.eup %2543 }
 0x4af   : > { %v2546_v30 = vpop.eup %2545  ;;  %v1544_v26 = vmul.f32 %v2544_v28, %v1492_v23  ;;  %vm1550_vm2 = vweird.f32 %v2544_v28 }
 0x4b0   : > { %v1534_v31 = vmul.f32 %v2546_v30, %v1491_v24  ;;  %vm1540_vm3 = vweird.f32 %v2546_v30  ;;  %vm1551_vm5 = vmor %vm1549_vm4, %vm1550_vm2 }
 0x4b1   : > { %v1545_v6 = vmul.f32 %v2544_v28, %v1544_v26  ;;  %vm1541_vm7 = vmor %vm1539_vm6, %vm1540_vm3 }
 0x4b2   : > { %v1535_v33 = vmul.f32 %v2546_v30, %v1534_v31 }
 0x4b3   : > { %v1546_v55 = vmul.f32 0.5, %v1545_v6 }
 0x4b4   : > { %v1536_v36 = vmul.f32 0.5, %v1535_v33 }
 0x4b5   : > { %v1547_v39 = vsub.f32 1.5, %v1546_v55 }
 0x4b6   : > { %v1537_v41 = vsub.f32 1.5, %v1536_v36 }
 0x4b7   : > { %v1548_v44 = vmul.f32 %v2544_v28, %v1547_v39 }
 0x4b8   : > { %v1538_v45 = vmul.f32 %v2546_v30, %v1537_v41 }
 0x4b9   : > { %v1552_v47 = vsel %vm1551_vm5, %v2544_v28, %v1548_v44 }
 0x4ba   : > { %v1542_v11 = vsel %vm1541_vm7, %v2546_v30, %v1538_v45  ;;  %v1558_v49 = vmul.f32 %v1552_v47, %v3510_v58  ;;  %v3556_v58 = vld [vmem:[%s3664_s13] sm:$0xf]  ;;  %v1926_v45 = vld [vmem:[#allocation22 + $0x78] sm:$0xff]  ;;  %v1924_v47 = vld [vmem:[#allocation22 + $0x68] sm:$0xff] }
 0x4bb   : > { %v1557_v48 = vmul.f32 %v1542_v11, %v3513_v35  ;;  %v1923_v11 = vld [vmem:[#allocation22 + $0x60] sm:$0xff] }
 0x4bc   : > { %v1567_v56 = vmul.f32 %v3499_v16, %v1558_v49  ;;  %v1921_v49 = vld [vmem:[#allocation22 + $0x50] sm:$0xff] }
 0x4bd   : > { %v1629_v51 = vpop.f32.mrf.mxu0  ;;  %v1566_v52 = vmul.f32 %v3499_v16, %v1557_v48  ;;  %v1922_v48 = vld [vmem:[#allocation22 + $0x58] sm:$0xff] }
 0x4be   : > { %v1630_v53 = vadd.f32 %v3545_v50, %v1629_v51  ;;  %v1576_v59 = vadd.f32 %v3505_v22, %v1567_v56  ;;  %v1919_v51 = vld [vmem:[#allocation22 + $0x40] sm:$0xff] }
 0x4bf   : > { %v1575_v54 = vadd.f32 %v3505_v22, %v1566_v52  ;;  %v1654_v22 = vld [vmem:[#allocation20 + $0x48] sm:$0xff]  ;;  %v1918_v52 = vld [vmem:[#allocation22 + $0x38] sm:$0xff]  ;;  %v1915_v56 = vld [vmem:[#allocation22 + $0x20] sm:$0xff] }
 0x4c0   : > { %2338 = vmatpush.msk.msra.mxu2 %vm1666_vm8, %v1630_v53  ;;  %v1582_v61 = vmul.f32 0.01, %v1576_v59  ;;  %v1712_v62 = vrot.slane %v1630_v53, 4  ;;  %1788 = vmatpush.msrb.mxu3 %v1654_v22  ;;  %v1917_v53 = vld [vmem:[#allocation22 + $0x30] sm:$0xff] }
 0x4c1   : > { %v1581_v35 = vmul.f32 0.01, %v1575_v54  ;;  %1836 = vmatpush.msra.mxu0 %v1654_v22 }
 0x4c2   : > { %1685 = vmatpush.msra.mxu2 %v1627_v17  ;;  %v1588_v63 = vmax.f32 %v1576_v59, %v1582_v61  ;;  %1789 = vmatpush.msrb.mxu3 %v1653_v1  ;;  %v1914_v17 = vld [vmem:[#allocation22 + $0x18] sm:$0xff] }
 0x4c3   : > { %2339 = vmatmul.msk.f32.vlgmr.msra.gmra.mxu2 %vm1662_vm9, %v3556_v58  ;;  %v1587_v57 = vmax.f32 %v1575_v54, %v1581_v35  ;;  %1837 = vmatpush.msra.mxu0 %v1653_v1  ;;  %v1916_v54 = vld [vmem:[#allocation22 + $0x28] sm:$0xff] }
 0x4c4   : > { %1690 = vmatpush.msrb.mxu2 %v3528_v29  ;;  %1790 = vmatpush.msrb.mxu3 %v1652_v2  ;;  %v1912_v35 = vld [vmem:[#allocation22 + $0x8] sm:$0xff] }
 0x4c5   : > { %1637 = vmatmul.f32.gmra.mxu0 %v1587_v57  ;;  %v1911_v57 = vld [vmem:[#allocation22] sm:$0xff] }
 0x4c6   : > { %v1632_v16 = vpop.f32.mrf.mxu0  ;;  %1691 = vmatpush.msrb.mxu2 %v3532_v32  ;;  %1838 = vmatpush.msra.mxu0 %v1652_v2 }
 0x4c7   : > { %v1633_v60 = vadd.f32 %v3545_v50, %v1632_v16  ;;  %1791 = vmatpush.msrb.mxu3 %v1651_v3 }
 0x4c8   : > { %1692 = vmatpush.msrb.mxu2 %v3536_v34  ;;  %1839 = vmatpush.msra.mxu0 %v1651_v3 }
 0x4c9   : > { %v1713_v37 = vrot.slane %v1633_v60, 4  ;;  %1792 = vmatpush.msrb.mxu3 %v1650_v4 }
 0x4ca   : > { %1693 = vmatpush.msrb.mxu2 %v1657_v38  ;;  %1840 = vmatpush.msra.mxu0 %v1650_v4 }
 0x4cb   : > { %2340 = vmatpush.msk.msrb.mxu1 %vm1666_vm8, %v1713_v37  ;;  %v1714_v0 = vsel %vm1666_vm8, %v1712_v62, %v1713_v37  ;;  %1793 = vmatpush.msrb.mxu3 %v1649_v7 }
 0x4cc   : > { %1694 = vmatpush.msrb.mxu2 %v1656_v42  ;;  %1841 = vmatpush.msra.mxu0 %v1649_v7 }
 0x4cd   : > { %1640 = vmatmul.f32.gmra.mxu0 %v1588_v63  ;;  %1733 = vmatpush.msrb.mxu1 %v1714_v0 }
 0x4ce   : > { %2341 = vmatmul.msk.f32.vlgmr.msrb.gmra.mxu1 %vm1662_vm9, %v3556_v58  ;;  %1695 = vmatpush.msrb.mxu2 %v1655_v46 }
 0x4cf   : > { %1738 = vmatpush.msra.mxu1 %v3528_v29  ;;  %1794 = vmatpush.msrb.mxu3 %v1648_v8 }
 0x4d0   : > { %1696 = vmatpush.msrb.mxu2 %v1654_v22  ;;  %1842 = vmatpush.msra.mxu0 %v1648_v8 }
 0x4d1   : > { %1739 = vmatpush.msra.mxu1 %v3532_v32  ;;  %1795 = vmatpush.msrb.mxu3 %v1647_v19 }
 0x4d2   : > { %1697 = vmatpush.msrb.mxu2 %v1653_v1  ;;  %1843 = vmatpush.msra.mxu0 %v1647_v19 }
 0x4d3   : > { %1740 = vmatpush.msra.mxu1 %v3536_v34  ;;  %1796 = vmatpush.msrb.mxu3 %v1646_v9 }
 0x4d4   : > { %1698 = vmatpush.msrb.mxu2 %v1652_v2  ;;  %1844 = vmatpush.msra.mxu0 %v1646_v9 }
 0x4d5   : > { %1741 = vmatpush.msra.mxu1 %v1657_v38  ;;  %1797 = vmatpush.msrb.mxu3 %v1645_v10 }
 0x4d6   : > { %1699 = vmatpush.msrb.mxu2 %v1651_v3  ;;  %1845 = vmatpush.msra.mxu0 %v1645_v10 }
 0x4d7   : > { %1742 = vmatpush.msra.mxu1 %v1656_v42 }
 0x4d8   : > { %1700 = vmatpush.msrb.mxu2 %v1650_v4 }
 0x4d9   : > { %1743 = vmatpush.msra.mxu1 %v1655_v46  ;;  %v1925_v46 = vld [vmem:[#allocation22 + $0x70] sm:$0xff] }
 0x4da   : > { %1701 = vmatpush.msrb.mxu2 %v1649_v7 }
 0x4db   : > { %1744 = vmatpush.msra.mxu1 %v1654_v22 }
 0x4dc   : > { %1702 = vmatpush.msrb.mxu2 %v1648_v8 }
 0x4dd   : > { %1745 = vmatpush.msra.mxu1 %v1653_v1 }
 0x4de   : > { %1703 = vmatpush.msrb.mxu2 %v1647_v19 }
 0x4df   : > { %1746 = vmatpush.msra.mxu1 %v1652_v2 }
 0x4e0   : > { %1704 = vmatpush.msrb.mxu2 %v1646_v9 }
 0x4e1   : > { %1747 = vmatpush.msra.mxu1 %v1651_v3 }
 0x4e2   : > { %1705 = vmatpush.msrb.mxu2 %v1645_v10 }
 0x4e3   : > { %1748 = vmatpush.msra.mxu1 %v1650_v4  ;;  %v2517_v4 = vld [vmem:[%s3724_s24] ss:$0 sm:$0xff]  ;;  %s3728_s24 = sld [smem:[#allocation50_spill]] }
 0x4e5   : > { %1749 = vmatpush.msra.mxu1 %v1649_v7 }
 0x4e7   : > { %1750 = vmatpush.msra.mxu1 %v1648_v8 }
 0x4e9   : > { %1751 = vmatpush.msra.mxu1 %v1647_v19 }
 0x4eb   : > { %1752 = vmatpush.msra.mxu1 %v1646_v9  ;;  %v2518_v9 = vld [vmem:[%s3725_s11] ss:$0 sm:$0xff]  ;;  %s3729_s11 = sld [smem:[#allocation52_spill]] }
 0x4ed   : > { %1753 = vmatpush.msra.mxu1 %v1645_v10 }
 0x529   : > { %v1635_v43 = vpop.f32.mrf.mxu0 }
 0x52a   : > { %v1636_v14 = vadd.f32 %v3545_v50, %v1635_v43 }
 0x542   : > { %v1638_v12 = vpop.f32.mrf.mxu0 }
 0x543   : > { %v1639_v13 = vadd.f32 %v3545_v50, %v1638_v12 }
 0x545   : > { %2342 = vmatpush.msk.msra.mxu2 %vm1666_vm8, %v1639_v13  ;;  %v1804_v24 = vrot.slane %v1639_v13, 4 }
 0x546   : > { %v1687_v15 = vpop.f32.mrf.mxu2 }
 0x547   : > { %1777 = vmatpush.msra.mxu2 %v1636_v14 }
 0x548   : > { %1706 = vmatmul.f32.vlgmr.msrb.gmra.mxu2 %v1687_v15 }
 0x54a   : > { %v1641_v18 = vpop.f32.mrf.mxu0 }
 0x54b   : > { %v1642_v20 = vadd.f32 %v3545_v50, %v1641_v18  ;;  %v1735_v23 = vpop.f32.mrf.mxu1  ;;  %v1920_v50 = vld [vmem:[#allocation22 + $0x48] sm:$0xff] }
 0x54c   : > { %1754 = vmatmul.f32.vlgmr.msra.gmra.mxu1 %v1735_v23 }
 0x54d   : > { %v1805_v25 = vrot.slane %v1642_v20, 4 }
 0x54f   : > { %2344 = vmatpush.msk.msrb.mxu2 %vm1666_vm8, %v1805_v25  ;;  %v1806_v27 = vsel %vm1666_vm8, %v1804_v24, %v1805_v25 }
 0x550   : > { %2343 = vmatmul.msk.f32.vlgmr.msra.gmra.mxu2 %vm1662_vm9, %v3556_v58 }
 0x551   : > { %1825 = vmatpush.msrb.mxu2 %v1806_v27 }
 0x553   : > { %1931 = vmatpush.msra.mxu2 %v1926_v45  ;;  %v2027_v45 = vld [vmem:[#allocation23 + $0x78] sm:$0xff] }
 0x554   : > { %2032 = vmatpush.msrb.mxu1 %v2027_v45 }
 0x555   : > { %1932 = vmatpush.msra.mxu2 %v1925_v46  ;;  %v2026_v46 = vld [vmem:[#allocation23 + $0x70] sm:$0xff] }
 0x556   : > { %2033 = vmatpush.msrb.mxu1 %v2026_v46 }
 0x557   : > { %1933 = vmatpush.msra.mxu2 %v1924_v47  ;;  %v2025_v47 = vld [vmem:[#allocation23 + $0x68] sm:$0xff] }
 0x558   : > { %2345 = vmatmul.msk.f32.vlgmr.msrb.gmra.mxu2 %vm1662_vm9, %v3556_v58  ;;  %v1913_v58 = vld [vmem:[#allocation22 + $0x10] sm:$0xff]  ;;  %2034 = vmatpush.msrb.mxu1 %v2025_v47 }
 0x559   : > { %1934 = vmatpush.msra.mxu2 %v1923_v11  ;;  %v2024_v11 = vld [vmem:[#allocation23 + $0x60] sm:$0xff] }
 0x55a   : > { %2035 = vmatpush.msrb.mxu1 %v2024_v11 }
 0x55b   : > { %1935 = vmatpush.msra.mxu2 %v1922_v48  ;;  %v2023_v48 = vld [vmem:[#allocation23 + $0x58] sm:$0xff] }
 0x55c   : > { %2036 = vmatpush.msrb.mxu1 %v2023_v48 }
 0x55d   : > { %1936 = vmatpush.msra.mxu2 %v1921_v49  ;;  %v2022_v49 = vld [vmem:[#allocation23 + $0x50] sm:$0xff] }
 0x55e   : > { %2037 = vmatpush.msrb.mxu1 %v2022_v49 }
 0x55f   : > { %1937 = vmatpush.msra.mxu2 %v1920_v50  ;;  %v2021_v50 = vld [vmem:[#allocation23 + $0x48] sm:$0xff] }
 0x560   : > { %2038 = vmatpush.msrb.mxu1 %v2021_v50 }
 0x561   : > { %1938 = vmatpush.msra.mxu2 %v1919_v51  ;;  %v2020_v51 = vld [vmem:[#allocation23 + $0x40] sm:$0xff] }
 0x562   : > { %2039 = vmatpush.msrb.mxu1 %v2020_v51 }
 0x563   : > { %1939 = vmatpush.msra.mxu2 %v1918_v52  ;;  %v2019_v52 = vld [vmem:[#allocation23 + $0x38] sm:$0xff] }
 0x564   : > { %2040 = vmatpush.msrb.mxu1 %v2019_v52 }
 0x565   : > { %1940 = vmatpush.msra.mxu2 %v1917_v53  ;;  %v2018_v53 = vld [vmem:[#allocation23 + $0x30] sm:$0xff] }
 0x566   : > { %2041 = vmatpush.msrb.mxu1 %v2018_v53 }
 0x567   : > { %1941 = vmatpush.msra.mxu2 %v1916_v54  ;;  %v2017_v54 = vld [vmem:[#allocation23 + $0x28] sm:$0xff] }
 0x568   : > { %2042 = vmatpush.msrb.mxu1 %v2017_v54 }
 0x569   : > { %1942 = vmatpush.msra.mxu2 %v1915_v56  ;;  %v2016_v56 = vld [vmem:[#allocation23 + $0x20] sm:$0xff] }
 0x56a   : > { %2043 = vmatpush.msrb.mxu1 %v2016_v56 }
 0x56b   : > { %1943 = vmatpush.msra.mxu2 %v1914_v17  ;;  %v2015_v17 = vld [vmem:[#allocation23 + $0x18] sm:$0xff] }
 0x56c   : > { %2044 = vmatpush.msrb.mxu1 %v2015_v17 }
 0x56d   : > { %1944 = vmatpush.msra.mxu2 %v1913_v58  ;;  %v2014_v58 = vld [vmem:[#allocation23 + $0x10] sm:$0xff] }
 0x56e   : > { %2045 = vmatpush.msrb.mxu1 %v2014_v58 }
 0x56f   : > { %1945 = vmatpush.msra.mxu2 %v1912_v35  ;;  %v2013_v35 = vld [vmem:[#allocation23 + $0x8] sm:$0xff] }
 0x570   : > { %2046 = vmatpush.msrb.mxu1 %v2013_v35 }
 0x571   : > { %1946 = vmatpush.msra.mxu2 %v1911_v57  ;;  %v2012_v57 = vld [vmem:[#allocation23] sm:$0xff] }
 0x572   : > { %2047 = vmatpush.msrb.mxu1 %v2012_v57 }
 0x5c9   : > { %v1755_v28 = vpop.f32.mrf.mxu1 }
 0x5ca   : > { %v1756_v29 = vadd.f32 %v1755_v28, %v1661_v21  ;;  %v2519_v28 = vld [vmem:[%s3726_s19] ss:$0 sm:$0xff]  ;;  %s3730_s19 = sld [smem:[#allocation51_spill]] }
 0x5cb   : > { %v1707_v30 = vpop.f32.mrf.mxu2 }
 0x5cc   : > { %v1708_v26 = vadd.f32 %v1707_v30, %v1661_v21  ;;  %1758 = vst [vmem:[#allocation3 + $0x4] sm:$0xf] %v1756_v29 }
 0x5ce   : > { %1710 = vst [vmem:[#allocation3] sm:$0xf] %v1708_v26 }
 0x5d3   : > { %v1779_v31 = vpop.f32.mrf.mxu2 }
 0x5d4   : > { %1798 = vmatmul.f32.vlgmr.msrb.gmra.mxu3 %v1779_v31 }
 0x5d5   : > { %v1851_v32 = vld [vmem:[#allocation3] sm:$0xff] }
 0x5d6   : > { %1855 = vadd.xlane.f32.xlu0 %v1851_v32 }
 0x5db   : > { %v1827_v6 = vpop.f32.mrf.mxu2 }
 0x5dc   : > { %1846 = vmatmul.f32.vlgmr.msra.gmra.mxu0 %v1827_v6 }
 0x649   : > { %v1856_v33 = vpop.xlane.xlu0 %1855 }
 0x64a   : > { %v1859_v34 = vmul.f32 0.015625, %v1856_v33 }
 0x64c   : > { %v3585_v55 = vsub.f32 %v1851_v32, %v1859_v34 }
 0x64e   : > { %v1863_v36 = vmul.f32 %v3425_v5, %v3585_v55 }
 0x650   : > { %v1865_v38 = vmul.f32 %v1863_v36, %v1863_v36 }
 0x652   : > { %1867 = vadd.xlane.f32.xlu2 %v1865_v38 }
 0x657   : > { %v1799_v39 = vpop.f32.mrf.mxu3 }
 0x658   : > { %v1800_v40 = vadd.f32 %v1799_v39, %v1661_v21 }
 0x659   : > { %v1847_v41 = vpop.f32.mrf.mxu0 }
 0x65a   : > { %1802 = vst [vmem:[#allocation3 + $0x8] sm:$0xf] %v1800_v40  ;;  %v1848_v42 = vadd.f32 %v1847_v41, %v1661_v21 }
 0x65c   : > { %1850 = vst [vmem:[#allocation3 + $0xc] sm:$0xf] %v1848_v42 }
 0x663   : > { %v1852_v44 = vld [vmem:[#allocation3 + $0x8] sm:$0xff] }
 0x664   : > { %1857 = vadd.xlane.f32.xlu1 %v1852_v44 }
 0x6c5   : > { %v1868_v59 = vpop.xlane.xlu2 %1867 }
 0x6c6   : > { %v1871_v16 = vmul.f32 0.015625, %v1868_v59 }
 0x6c8   : > { %v1873_v60 = vadd.f32 1e-05, %v1871_v16 }
 0x6ca   : > { %2547 = vrsqrt.f32 %v1873_v60  ;;  %vm1881_vm11 = vweird.f32 %v1873_v60 }
 0x6d0   : > { %v2548_v61 = vpop.eup %2547 }
 0x6d1   : > { %v1876_v62 = vmul.f32 %v2548_v61, %v1873_v60  ;;  %vm1882_vm10 = vweird.f32 %v2548_v61 }
 0x6d2   : > { %vm1883_vm12 = vmor %vm1881_vm11, %vm1882_vm10 }
 0x6d3   : > { %v1877_v37 = vmul.f32 %v2548_v61, %v1876_v62 }
 0x6d5   : > { %v1878_v63 = vmul.f32 0.5, %v1877_v37 }
 0x6d7   : > { %v1879_v0 = vsub.f32 1.5, %v1878_v63  ;;  %v1858_v22 = vpop.xlane.xlu1 %1857 }
 0x6d8   : > { %v1860_v1 = vmul.f32 0.015625, %v1858_v22 }
 0x6d9   : > { %v1880_v2 = vmul.f32 %v2548_v61, %v1879_v0 }
 0x6da   : > { %v1862_v3 = vsub.f32 %v1852_v44, %v1860_v1 }
 0x6db   : > { %v1884_v7 = vsel %vm1883_vm12, %v2548_v61, %v1880_v2 }
 0x6dc   : > { %v1895_v8 = vmul.f32 %v1884_v7, %v3585_v55  ;;  %v1864_v19 = vmul.f32 %v3425_v5, %v1862_v3 }
 0x6de   : > { %v1866_v10 = vmul.f32 %v1864_v19, %v1864_v19  ;;  %v1900_v43 = vmul.f32 %v2517_v4, %v1895_v8 }
 0x6e0   : > { %1869 = vadd.xlane.f32.xlu0 %v1866_v10  ;;  %v1905_v12 = vadd.f32 %v2518_v9, %v1900_v43 }
 0x6e2   : > { %v1907_v13 = vmul.f32 0.01, %v1905_v12 }
 0x6e4   : > { %v1909_v14 = vmax.f32 %v1905_v12, %v1907_v13 }
 0x6e6   : > { %1947 = vmatmul.f32.vlgmr.msra.gmra.mxu2 %v1909_v14 }
 0x753   : > { %v1870_v15 = vpop.xlane.xlu0 %1869 }
 0x754   : > { %v1872_v18 = vmul.f32 0.015625, %v1870_v15 }
 0x756   : > { %v1874_v20 = vadd.f32 1e-05, %v1872_v18 }
 0x758   : > { %2549 = vrsqrt.f32 %v1874_v20  ;;  %vm1891_vm14 = vweird.f32 %v1874_v20 }
 0x75e   : > { %v2550_v23 = vpop.eup %2549 }
 0x75f   : > { %v1886_v24 = vmul.f32 %v2550_v23, %v1874_v20  ;;  %vm1892_vm13 = vweird.f32 %v2550_v23 }
 0x760   : > { %vm1893_vm15 = vmor %vm1891_vm14, %vm1892_vm13 }
 0x761   : > { %v1887_v25 = vmul.f32 %v2550_v23, %v1886_v24 }
 0x763   : > { %v1888_v27 = vmul.f32 0.5, %v1887_v25  ;;  %v2522_v25 = vld [vmem:[%s3730_s19] ss:$0 sm:$0xff] }
 0x765   : > { %v1889_v21 = vsub.f32 1.5, %v1888_v27 }
 0x767   : > { %v1890_v29 = vmul.f32 %v2550_v23, %v1889_v21 }
 0x769   : > { %v1948_v30 = vpop.f32.mrf.mxu2  ;;  %v1894_v26 = vsel %vm1893_vm15, %v2550_v23, %v1890_v29 }
 0x76a   : > { %v1949_v31 = vadd.f32 %v2519_v28, %v1948_v30  ;;  %v1896_v32 = vmul.f32 %v1894_v26, %v1862_v3  ;;  %v2520_v3 = vld [vmem:[%s3727_s0] ss:$0 sm:$0xff]  ;;  %s2935_s0 = scalar_lea.hbm %s3731_s5, 12 }
 0x76c   : > { %1956 = vadd.xlane.f32.xlu1 %v1949_v31  ;;  %v1901_v6 = vmul.f32 %v2517_v4, %v1896_v32 }
 0x76e   : > { %v1906_v33 = vadd.f32 %v2518_v9, %v1901_v6  ;;  %v2521_v9 = vld [vmem:[%s3728_s24] ss:$0 sm:$0xff]  ;;  %s2114_s24 = scalar_lea.hbm %s3731_s5, %s2347_s3 }
 0x770   : > { %v1908_v34 = vmul.f32 0.01, %v1906_v33 }
 0x772   : > { %v1910_v55 = vmax.f32 %v1906_v33, %v1908_v34 }
 0x774   : > { %1950 = vmatmul.f32.gmra.mxu2 %v1910_v55 }
 0x7df   : > { %v1957_v36 = vpop.xlane.xlu1 %1956 }
 0x7e0   : > { %v1960_v38 = vmul.f32 0.015625, %v1957_v36 }
 0x7e2   : > { %v1962_v39 = vsub.f32 %v1949_v31, %v1960_v38 }
 0x7e4   : > { %v1964_v40 = vmul.f32 %v3425_v5, %v1962_v39 }
 0x7e6   : > { %v1966_v41 = vmul.f32 %v1964_v40, %v1964_v40 }
 0x7e8   : > { %1968 = vadd.xlane.f32.xlu0 %v1966_v41 }
 0x7f7   : > { %v1951_v42 = vpop.f32.mrf.mxu2 }
 0x7f8   : > { %v1952_v44 = vadd.f32 %v2519_v28, %v1951_v42 }
 0x7fa   : > { %1958 = vadd.xlane.f32.xlu2 %v1952_v44 }
 0x85b   : > { %v1969_v59 = vpop.xlane.xlu0 %1968 }
 0x85c   : > { %v1972_v16 = vmul.f32 0.015625, %v1969_v59 }
 0x85e   : > { %v1974_v60 = vadd.f32 1e-05, %v1972_v16 }
 0x860   : > { %2551 = vrsqrt.f32 %v1974_v60  ;;  %vm1982_vm1 = vweird.f32 %v1974_v60 }
 0x866   : > { %v2552_v61 = vpop.eup %2551 }
 0x867   : > { %v1977_v62 = vmul.f32 %v2552_v61, %v1974_v60  ;;  %vm1983_vm0 = vweird.f32 %v2552_v61 }
 0x868   : > { %vm1984_vm2 = vmor %vm1982_vm1, %vm1983_vm0 }
 0x869   : > { %v1978_v37 = vmul.f32 %v2552_v61, %v1977_v62 }
 0x86b   : > { %v1979_v63 = vmul.f32 0.5, %v1978_v37 }
 0x86d   : > { %v1980_v0 = vsub.f32 1.5, %v1979_v63  ;;  %v1959_v22 = vpop.xlane.xlu2 %1958 }
 0x86e   : > { %v1961_v1 = vmul.f32 0.015625, %v1959_v22 }
 0x86f   : > { %v1981_v2 = vmul.f32 %v2552_v61, %v1980_v0 }
 0x870   : > { %v1963_v4 = vsub.f32 %v1952_v44, %v1961_v1 }
 0x871   : > { %v1985_v7 = vsel %vm1984_vm2, %v2552_v61, %v1981_v2 }
 0x872   : > { %v1996_v8 = vmul.f32 %v1985_v7, %v1962_v39  ;;  %v1965_v19 = vmul.f32 %v3425_v5, %v1963_v4  ;;  %v2055_v5 = vld [vmem:[%s3729_s11] sm:$0xf]  ;;  %s2118_s11 = sshll.u32 %s2114_s24, 4  ;;  %s2119_s11 = int_to_ptr.hbm [resolvable:$true] %s2118_s11 }
 0x873   : > { %v2066_v21 = vrot.slane %v2055_v5, 4  ;;  %s2929_s16 = sshra.s32 %s2119_s11, 4  ;;  %s2930_s16 = int_to_ptr.hbm [resolvable:$true] %s2929_s16 }
 0x874   : > { %v2001_v10 = vmul.f32 %v2520_v3, %v1996_v8  ;;  %v1967_v43 = vmul.f32 %v1965_v19, %v1965_v19  ;;  %s2931_s19 = scalar_lea.hbm %s2930_s16, 4  ;;  %p2936_p5 = scmp.lt.s32.totalorder %s2930_s16, %s3731_s5 }
 0x875   : > { %p2932_p1 = scmp.ne.s32.totalorder %s2930_s16, %s2931_s19  ;;  %p2937_p6 = scmp.lt.s32.totalorder %s2935_s0, %s2931_s19 }
 0x876   : > { %1970 = vadd.xlane.f32.xlu1 %v1967_v43  ;;  %v2006_v12 = vadd.f32 %v2521_v9, %v2001_v10 }
 0x877   : > { %p2933_p3 = pnand %p2932_p1, %p3287_p12  ;;  %p2938_p7 = por %p2937_p6, %p2936_p5 }
 0x878   : > { %v2008_v13 = vmul.f32 0.01, %v2006_v12 }
 0x879   : > { %p2934_p11 = pneg %p2933_p3 }
 0x87a   : > { %v2010_v14 = vmax.f32 %v2006_v12, %v2008_v13 }
 0x87b   : > { %p2939_p8 = pnand %p2938_p7, %p2934_p11 }
 0x87c   : > { %2048 = vmatmul.f32.vlgmr.msrb.gmra.mxu1 %v2010_v14 }
 0x8e9   : > { %v1971_v15 = vpop.xlane.xlu1 %1970 }
 0x8ea   : > { %v1973_v18 = vmul.f32 0.015625, %v1971_v15 }
 0x8ec   : > { %v1975_v20 = vadd.f32 1e-05, %v1973_v18 }
 0x8ee   : > { %2553 = vrsqrt.f32 %v1975_v20  ;;  %vm1992_vm4 = vweird.f32 %v1975_v20 }
 0x8f4   : > { %v2554_v23 = vpop.eup %2553 }
 0x8f5   : > { %v1987_v24 = vmul.f32 %v2554_v23, %v1975_v20  ;;  %vm1993_vm3 = vweird.f32 %v2554_v23 }
 0x8f6   : > { %vm1994_vm5 = vmor %vm1992_vm4, %vm1993_vm3 }
 0x8f7   : > { %v1988_v27 = vmul.f32 %v2554_v23, %v1987_v24 }
 0x8f9   : > { %v1989_v28 = vmul.f32 0.5, %v1988_v27  ;;  %v2049_v29 = vpop.f32.mrf.mxu1 }
 0x8fa   : > { %v2050_v30 = vadd.f32 %v2522_v25, %v2049_v29 }
 0x8fb   : > { %v1990_v26 = vsub.f32 1.5, %v1989_v28 }
 0x8fc   : > { %v2056_v31 = vmul.f32 %v2055_v5, %v2050_v30  ;;  %v2068_v32 = vmul.f32 %v2066_v21, %v2050_v30 }
 0x8fd   : > { %v1991_v6 = vmul.f32 %v2554_v23, %v1990_v26 }
 0x8fe   : > { %v2057_v33 = vsel %vm1666_vm8, %v2056_v31, 0.0  ;;  %v2070_v34 = vrot.slane %v2068_v32, 4 }
 0x8ff   : > { %v1995_v55 = vsel %vm1994_vm5, %v2554_v23, %v1991_v6  ;;  %v2058_v36 = vrot.slane %v2057_v33, 4 }
 0x900   : > { %v2072_v38 = vsel %vm1666_vm8, %v2070_v34, 0.0  ;;  %v1997_v39 = vmul.f32 %v1995_v55, %v1963_v4 }
 0x901   : > { %v2059_v40 = vadd.f32 %v2058_v36, %v2057_v33  ;;  %v2073_v41 = vrot.slane %v2072_v38, 4 }
 0x902   : > { %v2002_v42 = vmul.f32 %v2520_v3, %v1997_v39 }
 0x903   : > { %v2060_v44 = vrot.slane %v2059_v40, 2  ;;  %v2074_v45 = vadd.f32 %v2073_v41, %v2072_v38 }
 0x904   : > { %v2007_v46 = vadd.f32 %v2521_v9, %v2002_v42 }
 0x905   : > { %v2061_v47 = vadd.f32 %v2060_v44, %v2059_v40  ;;  %v2075_v11 = vrot.slane %v2074_v45, 2 }
 0x906   : > { %v2009_v48 = vmul.f32 0.01, %v2007_v46 }
 0x907   : > { %v2062_v49 = vrot.slane %v2061_v47, 1  ;;  %v2076_v50 = vadd.f32 %v2075_v11, %v2074_v45 }
 0x908   : > { %v2011_v51 = vmax.f32 %v2007_v46, %v2009_v48 }
 0x909   : > { %v2063_v52 = vadd.f32 %v2062_v49, %v2061_v47  ;;  %v2077_v53 = vrot.slane %v2076_v50, 1 }
 0x90a   : > { %2051 = vmatmul.f32.gmra.mxu1 %v2011_v51 }
 0x90b   : > { %2064 = vst [vmem:[#allocation4] sm:$0x1] %v2063_v52  ;;  %v2078_v54 = vadd.f32 %v2077_v53, %v2076_v50 }
 0x90d   : > { %2079 = vst [vmem:[#allocation4 + $0x1] sm:$0x1] %v2078_v54 }
 0x987   : > { %v2052_v56 = vpop.f32.mrf.mxu1 }
 0x988   : > { %v2053_v17 = vadd.f32 %v2522_v25, %v2052_v56 }
 0x98a   : > { %v2080_v58 = vmul.f32 %v2055_v5, %v2053_v17  ;;  %v2089_v35 = vmul.f32 %v2066_v21, %v2053_v17 }
 0x98c   : > { %v2081_v57 = vsel %vm1666_vm8, %v2080_v58, 0.0  ;;  %v2091_v59 = vrot.slane %v2089_v35, 4 }
 0x98d   : > { %v2082_v16 = vrot.slane %v2081_v57, 4 }
 0x98e   : > { %v2093_v60 = vsel %vm1666_vm8, %v2091_v59, 0.0 }
 0x98f   : > { %v2083_v61 = vadd.f32 %v2082_v16, %v2081_v57  ;;  %v2094_v62 = vrot.slane %v2093_v60, 4 }
 0x991   : > { %v2084_v37 = vrot.slane %v2083_v61, 2  ;;  %v2095_v63 = vadd.f32 %v2094_v62, %v2093_v60 }
 0x993   : > { %v2085_v0 = vadd.f32 %v2084_v37, %v2083_v61  ;;  %v2096_v22 = vrot.slane %v2095_v63, 2 }
 0x995   : > { %v2086_v1 = vrot.slane %v2085_v0, 1  ;;  %v2097_v2 = vadd.f32 %v2096_v22, %v2095_v63 }
 0x997   : > { %v2087_v3 = vadd.f32 %v2086_v1, %v2085_v0  ;;  %v2098_v4 = vrot.slane %v2097_v2, 1 }
 0x999   : > { %2088 = vst [vmem:[#allocation4 + $0x2] sm:$0x1] %v2087_v3  ;;  %v2099_v7 = vadd.f32 %v2098_v4, %v2097_v2 }
 0x99b   : > { %2100 = vst [vmem:[#allocation4 + $0x3] sm:$0x1] %v2099_v7 }
 0x9a2   : > { %v2101_v8 = vld [vmem:[#allocation4] sm:$0xf] }
 0x9a3   : > { %2102 = vst [vmem:[%s958_s17] sm:$0xf] %v2101_v8 }
 0x9a4   : > { %2942 = shalt.err (!%p2939_p8)
}
 0x9a5   : > { %2397 = dma.vmem_to_hbm [thread:$0]  (%p3287_p12), %s2117_s23, 64, %s2119_s11, %s2104_s14  }
 0x9a6 PF: > { %p2464_p9 = scmp.ge.s32.totalorder %s3005_s30, 2  ;;  %s2130_s25 = sand.u32 1, %s2993_s29  }
 0x9a7   : > { %s2131_s4 = scalar_lea.sflag [#allocation7], %s2130_s25 }
 0x9a8   : > { %p2438_p10 = pnand %p2464_p9, %p3292_p2 }
 0x9aa   : > { %p2439_p13 = pneg %p2438_p10 }
 0x9ac   : > { %2988 = dma.done.wait (%p2439_p13), %s2131_s4, 64  }
 0x9ad   : > { %2990 = vsyncadd (%p2439_p13), %s2131_s4, 4294967232  ;;  %p44_p0 = scmp.ge.s32.totalorder %s3267_s26, 5   ;;  %s3732_s29 = smov %s2997_s2 }
 0x9ae   : > { %s3733_s2 = smov %s3001_s6  ;;  %s3734_s6 = smov %s3279_s1 }
 0x9af   : > { %s3735_s30 = smov %s3267_s26  ;;  %46 = sbr.rel (!%p44_p0) target bundleno = 32 (0x20), region = 209 }
 0x9b4   :  { %2137 = vsyncpa [#allocation6], 1 }
 0x9b5   :  { %2139 = vsyncpa [#allocation6 + $0x1], 1 }
 0x9b6   :  { %2140 = vsyncpa [#allocation9], 1 }
 0x9b7   :  { %2141 = vsyncpa [#allocation12], 1 }
 0x9b8   :  { %2142 = vsyncpa [#allocation15], 1 }
 0x9b9   :  { %2143 = vsyncpa [#allocation18], 1 }
 0x9ba   :  { %2144 = vsyncpa [#allocation21], 1 }
 0x9bb   :  { %2145 = vsyncpa [#allocation24], 1 }
 0x9bc   :  { %2146 = vsyncpa [#allocation7], 1 }
 0x9bd   :  { %2148 = vsyncpa [#allocation7 + $0x1], 1 }

</bundles_post_ra>
